<compile_context>
chip_gen: v7x
topology: tpu7x:2x2x1
jax: 0.10.0
libtpu: 0.0.40
codegen_flags: <defaults>
</compile_context>

<pallas_src>
import jax
import jax.numpy as jnp
from jax import lax
from jax.experimental import pallas as pl
from jax.experimental.pallas import tpu as pltpu


# ----------------------------------------------------------------------------
# Fused conv3x3 (pad=1, stride=1) + folded-BN bias + ReLU kernel
# ----------------------------------------------------------------------------
def _conv3x3_bn_relu_kernel(x_ref, w_ref, b_ref, o_ref):
    # x_ref: (1, H+2, W+2, C)  bf16   zero-padded NHWC image for this batch el.
    # w_ref: (3, 3, C, OC)     bf16   BN-scale-folded conv weights (HWIO)
    # b_ref: (1, OC)           f32    folded bias: (conv_b - mean)*scale + beta
    # o_ref: (1, H*W, OC)      f32
    _, Hp, Wp, C = x_ref.shape
    H, W = Hp - 2, Wp - 2
    OC = o_ref.shape[-1]

    acc = jnp.zeros((H * W, OC), jnp.float32)
    # 9 shift-and-accumulate MXU matmuls (in-kernel im2col; nothing hits HBM).
    for dh in range(3):
        for dw in range(3):
            xs = x_ref[0, dh:dh + H, dw:dw + W, :]          # (H, W, C) bf16
            acc = acc + jnp.dot(
                xs.reshape(H * W, C), w_ref[dh, dw],
                preferred_element_type=jnp.float32)

    o_ref[0] = jnp.maximum(acc + b_ref[...], 0.0)


def _round_up(v, m):
    return (v + m - 1) // m * m


def unit_forward(params, x_nchw):
    """relu(bn(conv(x))) with eval-mode BN folded into the weights.

    x_nchw: (B, C, H, W) f32 (PyTorch layout). Returns (B, OC, H, W) f32.
    """
    w = params["w_folded"]                  # (3, 3, C, OC) bf16
    b = params["b_folded"]                  # (1, OC) f32
    B, C, H, W = x_nchw.shape
    OC = w.shape[-1]
    Hp, Wp = H + 2, W + 2

    # NCHW -> NHWC, zero pad (padding=1), cast to bf16. XLA fuses these into a
    # single pass producing the kernel's input tensor.
    xp = jnp.pad(jnp.transpose(x_nchw.astype(jnp.float32), (0, 2, 3, 1)),
                 ((0, 0), (1, 1), (1, 1), (0, 0))).astype(jnp.bfloat16)

    # Advisory cost hint for the XLA scheduler.
    flops = 2 * B * H * W * 9 * C * OC
    bytes_accessed = (xp.size * 2 + w.size * 2 + b.size * 4
                      + B * H * W * OC * 4)

    # Conservative VMEM budget (lane/sublane padded, x2 double buffering, x4
    # headroom), clamped so it is valid on v5e/v6e (128 MiB) and v7x (64 MiB).
    in_blk = Hp * _round_up(Wp, 8) * _round_up(C, 128) * 2
    out_blk = _round_up(H * W, 8) * _round_up(OC, 128) * 4
    w_blk = 9 * _round_up(C, 8) * _round_up(OC, 128) * 2
    b_blk = 8 * _round_up(OC, 128) * 4
    est = 2 * (in_blk + out_blk + w_blk + b_blk)
    vmem_limit = int(min(max(4 * est, 32 * 1024 * 1024), 100 * 1024 * 1024))

    out2d = pl.pallas_call(
        _conv3x3_bn_relu_kernel,
        out_shape=jax.ShapeDtypeStruct((B, H * W, OC), jnp.float32),
        grid=(B,),
        in_specs=[
            pl.BlockSpec((1, Hp, Wp, C), lambda i: (i, 0, 0, 0)),
            pl.BlockSpec((3, 3, C, OC), lambda i: (0, 0, 0, 0)),
            pl.BlockSpec((1, OC), lambda i: (0, 0)),
        ],
        out_specs=pl.BlockSpec((1, H * W, OC), lambda i: (i, 0, 0)),
        compiler_params=pltpu.CompilerParams(
            dimension_semantics=("parallel",),
            vmem_limit_bytes=vmem_limit),
        cost_estimate=pl.CostEstimate(
            flops=int(flops), transcendentals=0,
            bytes_accessed=int(bytes_accessed)),
    )(xp, w, b)

    # (B, H*W, OC) -> (B, H, W, OC) is a free contiguous reshape; the final
    # transpose restores the module's NCHW output contract.
    return jnp.transpose(out2d.reshape(B, H, W, OC), (0, 3, 1, 2))


# ----------------------------------------------------------------------------
# Parameter init (deterministic, synthetic) + BN folding
# ----------------------------------------------------------------------------
def init_params(key, in_channels, out_channels, eps=1e-5):
    ks = jax.random.split(key, 6)
    conv_w = jax.random.normal(
        ks[0], (3, 3, in_channels, out_channels), jnp.float32) * 0.05  # HWIO
    conv_b = jax.random.normal(ks[1], (out_channels,), jnp.float32) * 0.05
    gamma = 1.0 + 0.1 * jax.random.normal(ks[2], (out_channels,), jnp.float32)
    beta = 0.1 * jax.random.normal(ks[3], (out_channels,), jnp.float32)
    mean = 0.1 * jax.random.normal(ks[4], (out_channels,), jnp.float32)
    var = 1.0 + jnp.abs(0.2 * jax.random.normal(ks[5], (out_channels,),
                                                jnp.float32))
    # Fold eval-mode BN into the conv:  y*s + ((conv_b - mean)*s + beta)
    scale = gamma / jnp.sqrt(var + eps)
    w_folded = (conv_w * scale[None, None, None, :]).astype(jnp.bfloat16)
    b_folded = ((conv_b - mean) * scale + beta).reshape(
        1, out_channels).astype(jnp.float32)
    return {
        "conv_w": conv_w, "conv_b": conv_b,
        "gamma": gamma, "beta": beta, "mean": mean, "var": var,
        "w_folded": w_folded, "b_folded": b_folded,
    }


# ----------------------------------------------------------------------------
# Pure-JAX reference (un-folded conv -> BN(eval) -> ReLU), f32
# ----------------------------------------------------------------------------
def reference(params, x_nchw, eps=1e-5):
    x = jnp.transpose(x_nchw.astype(jnp.float32), (0, 2, 3, 1))
    y = lax.conv_general_dilated(
        x, params["conv_w"], window_strides=(1, 1), padding="SAME",
        dimension_numbers=("NHWC", "HWIO", "NHWC"),
        precision=lax.Precision.HIGHEST)
    y = y + params["conv_b"][None, None, None, :]
    s = params["gamma"] / jnp.sqrt(params["var"] + eps)
    y = (y - params["mean"][None, None, None, :]) * s \
        + params["beta"][None, None, None, :]
    y = jnp.maximum(y, 0.0)
    return jnp.transpose(y, (0, 3, 1, 2))


if __name__ == "__main__":
    key = jax.random.PRNGKey(0)
    k_param, k_x = jax.random.split(key)

    batch, in_channels, out_channels, spatial = 2, 4, 8, 16
    x = jax.random.normal(k_x, (batch, in_channels, spatial, spatial),
                          jnp.float32)
    params = init_params(k_param, in_channels, out_channels)

    fwd = jax.jit(unit_forward)
    out = jax.block_until_ready(fwd(params, x))

    assert out.shape == (batch, out_channels, spatial, spatial), out.shape
    assert out.dtype == jnp.float32
    assert bool(jnp.all(out >= 0.0))                     # ReLU

    ref = reference(params, x)
    max_err = float(jnp.max(jnp.abs(out - ref)))
    assert max_err < 2e-2, f"max abs error {max_err}"    # bf16 operand rounding

    print("KERNEL_OK")
</pallas_src>

<mosaic_0001>
module attributes {stable_mosaic.version = 11 : i64} {
  func.func @_conv3x3_bn_relu_kernel(%arg0: i32, %arg1: memref<1x18x18x4xbf16, #tpu.memory_space<vmem>>, %arg2: memref<3x3x4x8xbf16, #tpu.memory_space<vmem>>, %arg3: memref<1x8xf32, #tpu.memory_space<vmem>>, %arg4: memref<1x256x8xf32, #tpu.memory_space<vmem>>) attributes {dimension_semantics = [#tpu.dimension_semantics<parallel>], iteration_bounds = array<i64: 2>, scalar_prefetch = 0 : i64, scratch_operands = 0 : i64, tpu.core_type = #tpu.core_type<tc>, window_params = [{transform_indices = @transform_0, window_bounds = array<i64: 1, 18, 18, 4>}, {pipeline_mode = #tpu.pipeline_mode<synchronous>, transform_indices = @transform_1, window_bounds = array<i64: 3, 3, 4, 8>}, {pipeline_mode = #tpu.pipeline_mode<synchronous>, transform_indices = @transform_2, window_bounds = array<i64: 1, 8>}, {transform_indices = @transform_3, window_bounds = array<i64: 1, 256, 8>}]} {
    %cst = arith.constant 0.000000e+00 : f32
    %0 = vector.broadcast %cst : f32 to vector<256x8xf32>
    %c0 = arith.constant 0 : index
    %c0_0 = arith.constant 0 : index
    %c0_1 = arith.constant 0 : index
    %c0_2 = arith.constant 0 : index
    %1 = vector.load %arg1[%c0, %c0_0, %c0_1, %c0_2] : memref<1x18x18x4xbf16, #tpu.memory_space<vmem>>, vector<1x16x16x4xbf16>
    %2 = vector.shape_cast %1 : vector<1x16x16x4xbf16> to vector<16x16x4xbf16>
    %3 = vector.shape_cast %2 : vector<16x16x4xbf16> to vector<256x4xbf16>
    %c0_3 = arith.constant 0 : index
    %c0_4 = arith.constant 0 : index
    %c0_5 = arith.constant 0 : index
    %c0_6 = arith.constant 0 : index
    %4 = vector.load %arg2[%c0_3, %c0_4, %c0_5, %c0_6] : memref<3x3x4x8xbf16, #tpu.memory_space<vmem>>, vector<1x1x4x8xbf16>
    %5 = vector.shape_cast %4 : vector<1x1x4x8xbf16> to vector<4x8xbf16>
    %cst_7 = arith.constant dense<0.000000e+00> : vector<256x8xf32>
    %6 = tpu.matmul %3, %5, %cst_7 {dimension_numbers = #tpu.dot_dimension_numbers<[1], [0], [0], [1], [0, 0, 1, 1], [], []>} : vector<256x4xbf16>, vector<4x8xbf16>, vector<256x8xf32> -> vector<256x8xf32>
    %7 = arith.addf %0, %6 : vector<256x8xf32>
    %c0_8 = arith.constant 0 : index
    %c0_9 = arith.constant 0 : index
    %c1 = arith.constant 1 : index
    %c0_10 = arith.constant 0 : index
    %8 = vector.load %arg1[%c0_8, %c0_9, %c1, %c0_10] : memref<1x18x18x4xbf16, #tpu.memory_space<vmem>>, vector<1x16x16x4xbf16>
    %9 = vector.shape_cast %8 : vector<1x16x16x4xbf16> to vector<16x16x4xbf16>
    %10 = vector.shape_cast %9 : vector<16x16x4xbf16> to vector<256x4xbf16>
    %c0_11 = arith.constant 0 : index
    %c1_12 = arith.constant 1 : index
    %c0_13 = arith.constant 0 : index
    %c0_14 = arith.constant 0 : index
    %11 = vector.load %arg2[%c0_11, %c1_12, %c0_13, %c0_14] : memref<3x3x4x8xbf16, #tpu.memory_space<vmem>>, vector<1x1x4x8xbf16>
    %12 = vector.shape_cast %11 : vector<1x1x4x8xbf16> to vector<4x8xbf16>
    %cst_15 = arith.constant dense<0.000000e+00> : vector<256x8xf32>
    %13 = tpu.matmul %10, %12, %cst_15 {dimension_numbers = #tpu.dot_dimension_numbers<[1], [0], [0], [1], [0, 0, 1, 1], [], []>} : vector<256x4xbf16>, vector<4x8xbf16>, vector<256x8xf32> -> vector<256x8xf32>
    %14 = arith.addf %7, %13 : vector<256x8xf32>
    %c0_16 = arith.constant 0 : index
    %c0_17 = arith.constant 0 : index
    %c2 = arith.constant 2 : index
    %c0_18 = arith.constant 0 : index
    %15 = vector.load %arg1[%c0_16, %c0_17, %c2, %c0_18] : memref<1x18x18x4xbf16, #tpu.memory_space<vmem>>, vector<1x16x16x4xbf16>
    %16 = vector.shape_cast %15 : vector<1x16x16x4xbf16> to vector<16x16x4xbf16>
    %17 = vector.shape_cast %16 : vector<16x16x4xbf16> to vector<256x4xbf16>
    %c0_19 = arith.constant 0 : index
    %c2_20 = arith.constant 2 : index
    %c0_21 = arith.constant 0 : index
    %c0_22 = arith.constant 0 : index
    %18 = vector.load %arg2[%c0_19, %c2_20, %c0_21, %c0_22] : memref<3x3x4x8xbf16, #tpu.memory_space<vmem>>, vector<1x1x4x8xbf16>
    %19 = vector.shape_cast %18 : vector<1x1x4x8xbf16> to vector<4x8xbf16>
    %cst_23 = arith.constant dense<0.000000e+00> : vector<256x8xf32>
    %20 = tpu.matmul %17, %19, %cst_23 {dimension_numbers = #tpu.dot_dimension_numbers<[1], [0], [0], [1], [0, 0, 1, 1], [], []>} : vector<256x4xbf16>, vector<4x8xbf16>, vector<256x8xf32> -> vector<256x8xf32>
    %21 = arith.addf %14, %20 : vector<256x8xf32>
    %c0_24 = arith.constant 0 : index
    %c1_25 = arith.constant 1 : index
    %c0_26 = arith.constant 0 : index
    %c0_27 = arith.constant 0 : index
    %22 = vector.load %arg1[%c0_24, %c1_25, %c0_26, %c0_27] : memref<1x18x18x4xbf16, #tpu.memory_space<vmem>>, vector<1x16x16x4xbf16>
    %23 = vector.shape_cast %22 : vector<1x16x16x4xbf16> to vector<16x16x4xbf16>
    %24 = vector.shape_cast %23 : vector<16x16x4xbf16> to vector<256x4xbf16>
    %c1_28 = arith.constant 1 : index
    %c0_29 = arith.constant 0 : index
    %c0_30 = arith.constant 0 : index
    %c0_31 = arith.constant 0 : index
    %25 = vector.load %arg2[%c1_28, %c0_29, %c0_30, %c0_31] : memref<3x3x4x8xbf16, #tpu.memory_space<vmem>>, vector<1x1x4x8xbf16>
    %26 = vector.shape_cast %25 : vector<1x1x4x8xbf16> to vector<4x8xbf16>
    %cst_32 = arith.constant dense<0.000000e+00> : vector<256x8xf32>
    %27 = tpu.matmul %24, %26, %cst_32 {dimension_numbers = #tpu.dot_dimension_numbers<[1], [0], [0], [1], [0, 0, 1, 1], [], []>} : vector<256x4xbf16>, vector<4x8xbf16>, vector<256x8xf32> -> vector<256x8xf32>
    %28 = arith.addf %21, %27 : vector<256x8xf32>
    %c0_33 = arith.constant 0 : index
    %c1_34 = arith.constant 1 : index
    %c1_35 = arith.constant 1 : index
    %c0_36 = arith.constant 0 : index
    %29 = vector.load %arg1[%c0_33, %c1_34, %c1_35, %c0_36] : memref<1x18x18x4xbf16, #tpu.memory_space<vmem>>, vector<1x16x16x4xbf16>
    %30 = vector.shape_cast %29 : vector<1x16x16x4xbf16> to vector<16x16x4xbf16>
    %31 = vector.shape_cast %30 : vector<16x16x4xbf16> to vector<256x4xbf16>
    %c1_37 = arith.constant 1 : index
    %c1_38 = arith.constant 1 : index
    %c0_39 = arith.constant 0 : index
    %c0_40 = arith.constant 0 : index
    %32 = vector.load %arg2[%c1_37, %c1_38, %c0_39, %c0_40] : memref<3x3x4x8xbf16, #tpu.memory_space<vmem>>, vector<1x1x4x8xbf16>
    %33 = vector.shape_cast %32 : vector<1x1x4x8xbf16> to vector<4x8xbf16>
    %cst_41 = arith.constant dense<0.000000e+00> : vector<256x8xf32>
    %34 = tpu.matmul %31, %33, %cst_41 {dimension_numbers = #tpu.dot_dimension_numbers<[1], [0], [0], [1], [0, 0, 1, 1], [], []>} : vector<256x4xbf16>, vector<4x8xbf16>, vector<256x8xf32> -> vector<256x8xf32>
    %35 = arith.addf %28, %34 : vector<256x8xf32>
    %c0_42 = arith.constant 0 : index
    %c1_43 = arith.constant 1 : index
    %c2_44 = arith.constant 2 : index
    %c0_45 = arith.constant 0 : index
    %36 = vector.load %arg1[%c0_42, %c1_43, %c2_44, %c0_45] : memref<1x18x18x4xbf16, #tpu.memory_space<vmem>>, vector<1x16x16x4xbf16>
    %37 = vector.shape_cast %36 : vector<1x16x16x4xbf16> to vector<16x16x4xbf16>
    %38 = vector.shape_cast %37 : vector<16x16x4xbf16> to vector<256x4xbf16>
    %c1_46 = arith.constant 1 : index
    %c2_47 = arith.constant 2 : index
    %c0_48 = arith.constant 0 : index
    %c0_49 = arith.constant 0 : index
    %39 = vector.load %arg2[%c1_46, %c2_47, %c0_48, %c0_49] : memref<3x3x4x8xbf16, #tpu.memory_space<vmem>>, vector<1x1x4x8xbf16>
    %40 = vector.shape_cast %39 : vector<1x1x4x8xbf16> to vector<4x8xbf16>
    %cst_50 = arith.constant dense<0.000000e+00> : vector<256x8xf32>
    %41 = tpu.matmul %38, %40, %cst_50 {dimension_numbers = #tpu.dot_dimension_numbers<[1], [0], [0], [1], [0, 0, 1, 1], [], []>} : vector<256x4xbf16>, vector<4x8xbf16>, vector<256x8xf32> -> vector<256x8xf32>
    %42 = arith.addf %35, %41 : vector<256x8xf32>
    %c0_51 = arith.constant 0 : index
    %c2_52 = arith.constant 2 : index
    %c0_53 = arith.constant 0 : index
    %c0_54 = arith.constant 0 : index
    %43 = vector.load %arg1[%c0_51, %c2_52, %c0_53, %c0_54] : memref<1x18x18x4xbf16, #tpu.memory_space<vmem>>, vector<1x16x16x4xbf16>
    %44 = vector.shape_cast %43 : vector<1x16x16x4xbf16> to vector<16x16x4xbf16>
    %45 = vector.shape_cast %44 : vector<16x16x4xbf16> to vector<256x4xbf16>
    %c2_55 = arith.constant 2 : index
    %c0_56 = arith.constant 0 : index
    %c0_57 = arith.constant 0 : index
    %c0_58 = arith.constant 0 : index
    %46 = vector.load %arg2[%c2_55, %c0_56, %c0_57, %c0_58] : memref<3x3x4x8xbf16, #tpu.memory_space<vmem>>, vector<1x1x4x8xbf16>
    %47 = vector.shape_cast %46 : vector<1x1x4x8xbf16> to vector<4x8xbf16>
    %cst_59 = arith.constant dense<0.000000e+00> : vector<256x8xf32>
    %48 = tpu.matmul %45, %47, %cst_59 {dimension_numbers = #tpu.dot_dimension_numbers<[1], [0], [0], [1], [0, 0, 1, 1], [], []>} : vector<256x4xbf16>, vector<4x8xbf16>, vector<256x8xf32> -> vector<256x8xf32>
    %49 = arith.addf %42, %48 : vector<256x8xf32>
    %c0_60 = arith.constant 0 : index
    %c2_61 = arith.constant 2 : index
    %c1_62 = arith.constant 1 : index
    %c0_63 = arith.constant 0 : index
    %50 = vector.load %arg1[%c0_60, %c2_61, %c1_62, %c0_63] : memref<1x18x18x4xbf16, #tpu.memory_space<vmem>>, vector<1x16x16x4xbf16>
    %51 = vector.shape_cast %50 : vector<1x16x16x4xbf16> to vector<16x16x4xbf16>
    %52 = vector.shape_cast %51 : vector<16x16x4xbf16> to vector<256x4xbf16>
    %c2_64 = arith.constant 2 : index
    %c1_65 = arith.constant 1 : index
    %c0_66 = arith.constant 0 : index
    %c0_67 = arith.constant 0 : index
    %53 = vector.load %arg2[%c2_64, %c1_65, %c0_66, %c0_67] : memref<3x3x4x8xbf16, #tpu.memory_space<vmem>>, vector<1x1x4x8xbf16>
    %54 = vector.shape_cast %53 : vector<1x1x4x8xbf16> to vector<4x8xbf16>
    %cst_68 = arith.constant dense<0.000000e+00> : vector<256x8xf32>
    %55 = tpu.matmul %52, %54, %cst_68 {dimension_numbers = #tpu.dot_dimension_numbers<[1], [0], [0], [1], [0, 0, 1, 1], [], []>} : vector<256x4xbf16>, vector<4x8xbf16>, vector<256x8xf32> -> vector<256x8xf32>
    %56 = arith.addf %49, %55 : vector<256x8xf32>
    %c0_69 = arith.constant 0 : index
    %c2_70 = arith.constant 2 : index
    %c2_71 = arith.constant 2 : index
    %c0_72 = arith.constant 0 : index
    %57 = vector.load %arg1[%c0_69, %c2_70, %c2_71, %c0_72] : memref<1x18x18x4xbf16, #tpu.memory_space<vmem>>, vector<1x16x16x4xbf16>
    %58 = vector.shape_cast %57 : vector<1x16x16x4xbf16> to vector<16x16x4xbf16>
    %59 = vector.shape_cast %58 : vector<16x16x4xbf16> to vector<256x4xbf16>
    %c2_73 = arith.constant 2 : index
    %c2_74 = arith.constant 2 : index
    %c0_75 = arith.constant 0 : index
    %c0_76 = arith.constant 0 : index
    %60 = vector.load %arg2[%c2_73, %c2_74, %c0_75, %c0_76] : memref<3x3x4x8xbf16, #tpu.memory_space<vmem>>, vector<1x1x4x8xbf16>
    %61 = vector.shape_cast %60 : vector<1x1x4x8xbf16> to vector<4x8xbf16>
    %cst_77 = arith.constant dense<0.000000e+00> : vector<256x8xf32>
    %62 = tpu.matmul %59, %61, %cst_77 {dimension_numbers = #tpu.dot_dimension_numbers<[1], [0], [0], [1], [0, 0, 1, 1], [], []>} : vector<256x4xbf16>, vector<4x8xbf16>, vector<256x8xf32> -> vector<256x8xf32>
    %63 = arith.addf %56, %62 : vector<256x8xf32>
    %c0_78 = arith.constant 0 : index
    %c0_79 = arith.constant 0 : index
    %64 = vector.load %arg3[%c0_78, %c0_79] : memref<1x8xf32, #tpu.memory_space<vmem>>, vector<1x8xf32>
    %65 = vector.broadcast %64 : vector<1x8xf32> to vector<256x8xf32>
    %66 = arith.addf %63, %65 : vector<256x8xf32>
    %cst_80 = arith.constant 0.000000e+00 : f32
    %67 = vector.broadcast %cst_80 : f32 to vector<256x8xf32>
    %68 = arith.maximumf %66, %67 : vector<256x8xf32>
    %c0_81 = arith.constant 0 : index
    %c0_82 = arith.constant 0 : index
    %c0_83 = arith.constant 0 : index
    %69 = vector.load %arg4[%c0_81, %c0_82, %c0_83] : memref<1x256x8xf32, #tpu.memory_space<vmem>>, vector<1x256x8xf32>
    %70 = vector.shape_cast %69 : vector<1x256x8xf32> to vector<256x8xf32>
    %71 = vector.shape_cast %68 : vector<256x8xf32> to vector<1x256x8xf32>
    tpu.vector_store %arg4[%c0_81, %c0_82, %c0_83], %71 {strides = array<i32>} : memref<1x256x8xf32, #tpu.memory_space<vmem>>, vector<1x256x8xf32>,
    return
  }
  func.func @transform_0(%arg0: i32) -> (i32, i32, i32, i32) {
    %c0_i32 = arith.constant 0 : i32
    %c0_i32_0 = arith.constant 0 : i32
    %c0_i32_1 = arith.constant 0 : i32
    %c0_i32_2 = arith.constant 0 : i32
    return %arg0, %c0_i32, %c0_i32_0, %c0_i32_1 : i32, i32, i32, i32
  }
  func.func @transform_1(%arg0: i32) -> (i32, i32, i32, i32) {
    %c0_i32 = arith.constant 0 : i32
    %c0_i32_0 = arith.constant 0 : i32
    %c0_i32_1 = arith.constant 0 : i32
    %c0_i32_2 = arith.constant 0 : i32
    %c0_i32_3 = arith.constant 0 : i32
    return %c0_i32, %c0_i32_0, %c0_i32_1, %c0_i32_2 : i32, i32, i32, i32
  }
  func.func @transform_2(%arg0: i32) -> (i32, i32) {
    %c0_i32 = arith.constant 0 : i32
    %c0_i32_0 = arith.constant 0 : i32
    %c0_i32_1 = arith.constant 0 : i32
    return %c0_i32, %c0_i32_0 : i32, i32
  }
  func.func @transform_3(%arg0: i32) -> (i32, i32, i32) {
    %c0_i32 = arith.constant 0 : i32
    %c0_i32_0 = arith.constant 0 : i32
    %c0_i32_1 = arith.constant 0 : i32
    return %arg0, %c0_i32, %c0_i32_0 : i32, i32, i32
  }
}

</mosaic_0001>

<bundles_post_ra>
// kernel: unit_forward.1
= control target key start
LH: loop header
LB: loop body
LE: loop exit
PB: predicated region body
PF: predicated region fallthrough
CT: control target
= control target key end

     0   :  { %s6307_s12 = smov 0   ;;  %s8140_s0 = inlined_call_operand.vmem [shape: bf16[2,18,18,4], index: 0, kind: input, shape index: {}]   ;;  %s8141_s1 = inlined_call_operand.vmem [shape: bf16[3,3,4,8], index: 1, kind: input, shape index: {}]   ;;  %s8142_s2 = inlined_call_operand.vmem [shape: f32[1,8], index: 2, kind: input, shape index: {}]   ;;  %s8143_s3 = inlined_call_operand.vmem [shape: f32[2,256,8], index: 3, kind: output, shape index: {}]  }
   0x1 LB: > { %s4890_s13 = sadd.s32 4294967295, %s6285_s12   ;;  %p4894_p0 = scmp.ge.s32.totalorder %s6285_s12, 1  ;;  %s6285_s12 = sphi %s6307_s12, %s13_s12  }
   0x2   : > { %p137_p1 = scmp.lt.s32.totalorder %s6285_s12, 3 }
   0x4   : > { %p138_p2 = pnand %p4894_p0, %p137_p1 }
   0x6   : > { %141 = sbr.rel (%p138_p2) target bundleno = 587 (0x24b), region = 32 }
   0xd   : > { %v4898_v0 = vld [vmem:[%s8141_s1 + $0x2] sm:$0x3]  ;;  %vm707_vm0 = vcmask 1041408   ;;  %v5125_v1 = vld [vmem:[%s8141_s1 + $0x8] sm:$0x3]  ;;  %p161_p3 = scmp.lt.s32.totalorder %s4890_s13, 1 }
   0xe   : > { %6155 = vmatprep.subr.msk.bf16.mxu1 %vm707_vm0, %v4898_v0  ;;  %6159 = vmatprep.subr.msk.bf16.mxu0 %vm707_vm0, %v5125_v1  ;;  %v709_v2 = vsel %vm707_vm0, %v4898_v0, 0  ;;  %v6325_v3 = vsel %vm707_vm0, %v5125_v1, 0  ;;  %v204_v4 = vld [vmem:[%s8141_s1] sm:$0x3]  ;;  %v5190_v5 = vld [vmem:[%s8141_s1 + $0xa] sm:$0x3] }
   0xf   : > { %8157 = vst [vmem:[#allocation2_spill] sm:$0xff] %v6325_v3  ;;  %5592 = vmatpush3.bf16.msra.mxu1 %v709_v2  ;;  %5728 = vmatpush3.bf16.msra.mxu0 %v6325_v3  ;;  %s8212_s13 = smov (!%p161_p3, %s4890_s13), 1  ;;  %vm221_vm1 = vsmask.f32 3328  ;;  %vm222_vm2 = vsmask.f32 7440 }
  0x10   : > { %6156 = vmatprep.subr.msk.bf16.mxu1 %vm707_vm0, %v204_v4  ;;  %6161 = vmatprep.subr.msk.bf16.mxu0 %vm707_vm0, %v5190_v5  ;;  %s6165_s22 = smul.u32 216, %s8212_s13  ;;  %vm658_vm3 = vcmask 31744   ;;  %v6355_v17 = vsel %vm707_vm0, %v204_v4, 0  ;;  %v6361_v26 = vld [vmem:[%s8141_s1 + $0xc] sm:$0x3]  ;;  %vm6368_vm4 = vmor %vm221_vm1, %vm222_vm2  ;;  %v6374_v37 = vsel %vm707_vm0, %v5190_v5, 0 }
  0x11   : > { %v6378_v41 = vsel %vm707_vm0, %v6361_v26, 0  ;;  %vm1212_vm5 = vcmask 1042432   ;;  %vm1213_vm6 = vcmask 1046532   ;;  %s5437_s17 = sshll.u32 %s8212_s13, 8  ;;  %vm4802_vm8 = vcmask 64512  }
  0x12   : > { %s6342_s25 = scalar_lea.vmem %s8140_s0, %s6165_s22  ;;  %vm6594_vm7 = vmor %vm1212_vm5, %vm1213_vm6  ;;  %s8036_s20 = scalar_lea.vmem %s8143_s3, %s5437_s17 }
  0x13   : > { %v172_v6 = vld [vmem:[%s6342_s25] sm:$0xf]  ;;  %v173_v7 = vld [vmem:[%s6342_s25 + $0x4] sm:$0xf]  ;;  %v205_v8 = vld [vmem:[%s6342_s25 + $0x8] sm:$0x1] }
  0x14   : > { %v225_v9 = vshrl.u32 %v172_v6, 16  ;;  %v228_v10 = vshll.u32 %v172_v6, 16  ;;  %v234_v11 = vshll.u32 %v173_v7, 16  ;;  %v238_v12 = vshrl.u32 %v173_v7, 16  ;;  %v5077_v13 = vld [vmem:[%s6342_s25 + $0xc] sm:$0xf] }
  0x15   : > { %v244_v14 = vshll.u32 %v205_v8, 16  ;;  %v6349_v15 = vld [vmem:[%s6342_s25 + $0x10] sm:$0xf]  ;;  %v6352_v16 = vld [vmem:[%s6342_s25 + $0x14] sm:$0x1]  ;;  %v2029_v23 = vshrl.u32 %v5077_v13, 16 }
  0x16   : > { %v227_v18 = vrot.slane %v225_v9, 4  ;;  %v230_v19 = vrot.slane %v228_v10, 5  ;;  %v236_v20 = vrot.slane %v234_v11, 5  ;;  %v240_v21 = vrot.slane %v238_v12, 4  ;;  %v174_v31 = vld [vmem:[%s6342_s25 + $0xc] sm:$0xf] }
  0x17   : > { %v246_v22 = vrot.slane %v244_v14, 5  ;;  %v2032_v24 = vshll.u32 %v5077_v13, 16  ;;  %v2038_v25 = vshll.u32 %v6349_v15, 16  ;;  %v2042_v29 = vshrl.u32 %v6349_v15, 16  ;;  %v175_v36 = vld [vmem:[%s6342_s25 + $0x10] sm:$0xf] }
  0x18   : > { %v231_v27 = vor.u32 %v230_v19, %v227_v18  ;;  %v241_v28 = vor.u32 %v240_v21, %v236_v20  ;;  %v2048_v30 = vshll.u32 %v6352_v16, 16  ;;  %v2031_v33 = vrot.slane %v2029_v23, 4  ;;  %v206_v44 = vld [vmem:[%s6342_s25 + $0x14] sm:$0x1]  ;;  %v5080_v55 = vld [vmem:[%s6342_s25 + $0x18] sm:$0xf] }
  0x19   : > { %v2034_v34 = vrot.slane %v2032_v24, 5  ;;  %v2040_v35 = vrot.slane %v2038_v25, 5  ;;  %v2044_v40 = vrot.slane %v2042_v29, 4  ;;  %v249_v45 = vshrl.u32 %v174_v31, 16  ;;  %v6387_v60 = vld [vmem:[%s6342_s25 + $0x1c] sm:$0xf] }
  0x1a   : > { %v232_v38 = vrot.slane %v231_v27, 4  ;;  %v242_v39 = vrot.slane %v241_v28, 4  ;;  %v2050_v43 = vrot.slane %v2048_v30, 5  ;;  %v252_v46 = vshll.u32 %v174_v31, 16  ;;  %v6395_v1 = vld [vmem:[%s6342_s25 + $0x20] sm:$0x1] }
  0x1b   : > { %v2035_v42 = vor.u32 %v2034_v34, %v2031_v33  ;;  %v2045_v49 = vor.u32 %v2044_v40, %v2040_v35  ;;  %v258_v50 = vshll.u32 %v175_v36, 16  ;;  %v251_v53 = vrot.slane %v249_v45, 4  ;;  %v176_v18 = vld [vmem:[%s6342_s25 + $0x18] sm:$0xf]  ;;  %v177_v23 = vld [vmem:[%s6342_s25 + $0x1c] sm:$0xf] }
  0x1c   : > { %v237_v47 = vsel %vm6368_vm4, %v232_v38, %v236_v20  ;;  %v247_v48 = vsel %vm6368_vm4, %v242_v39, %v246_v22  ;;  %v254_v54 = vrot.slane %v252_v46, 5  ;;  %v262_v58 = vshrl.u32 %v175_v36, 16  ;;  %v207_v31 = vld [vmem:[%s6342_s25 + $0x20] sm:$0x1]  ;;  %v5083_v40 = vld [vmem:[%s6342_s25 + $0x24] sm:$0xf] }
  0x1d   : > { %v4899_v51 = vcombine.low %v237_v47, %v247_v48  ;;  %v2036_v52 = vrot.slane %v2035_v42, 4  ;;  %v2046_v56 = vrot.slane %v2045_v49, 4  ;;  %v260_v57 = vrot.slane %v258_v50, 5  ;;  %v6418_v46 = vld [vmem:[%s6342_s25 + $0x28] sm:$0xf] }
  0x1e   : > { %v268_v59 = vshll.u32 %v206_v44, 16  ;;  %v2772_v62 = vrot.slane %v6349_v15, 5  ;;  %v2775_v63 = vrot.slane %v6352_v16, 5  ;;  %v255_v0 = vor.u32 %v254_v54, %v251_v53  ;;  %v6427_v54 = vld [vmem:[%s6342_s25 + $0x2c] sm:$0x1] }
  0x1f   : > { %5593 = vmatprep.mubr.msk.bf16.mxu1 %vm658_vm3, %v4899_v51  ;;  %v2041_v61 = vsel %vm6368_vm4, %v2036_v52, %v2040_v35  ;;  %v2051_v2 = vsel %vm6368_vm4, %v2046_v56, %v2050_v43  ;;  %v264_v4 = vrot.slane %v262_v58, 4  ;;  %v2053_v6 = vshrl.u32 %v5080_v55, 16  ;;  %v4979_v51 = vld [vmem:[%s8141_s1 + $0x4] sm:$0x3]  ;;  %v6627_v16 = vld [vmem:[%s6342_s25 + $0x7c] sm:$0xf] }
  0x20   : > { %v270_v5 = vrot.slane %v268_v59, 5  ;;  %v5126_v7 = vcombine.low %v2041_v61, %v2051_v2  ;;  %v256_v8 = vrot.slane %v255_v0, 4  ;;  %v2056_v9 = vshll.u32 %v5080_v55, 16  ;;  %v178_v0 = vld [vmem:[%s6342_s25 + $0x24] sm:$0xf] }
  0x21   : > { %v2062_v10 = vshll.u32 %v6387_v60, 16  ;;  %v265_v11 = vor.u32 %v264_v4, %v260_v57  ;;  %v2055_v12 = vrot.slane %v2053_v6, 4  ;;  %v2066_v13 = vshrl.u32 %v6387_v60, 16 }
  0x22   : > { %v2072_v14 = vshll.u32 %v6395_v1, 16  ;;  %5729 = vmatprep.mubr.msk.bf16.mxu0 %vm658_vm3, %v5126_v7  ;;  %v261_v19 = vsel %vm6368_vm4, %v256_v8, %v260_v57  ;;  %v2058_v20 = vrot.slane %v2056_v9, 5  ;;  %v2779_v22 = vrot.slane %v6387_v60, 5  ;;  %v179_v7 = vld [vmem:[%s6342_s25 + $0x28] sm:$0xf] }
  0x23   : > { %v2064_v21 = vrot.slane %v2062_v10, 5  ;;  %v266_v24 = vrot.slane %v265_v11, 4  ;;  %v2068_v25 = vrot.slane %v2066_v13, 4  ;;  %v2782_v28 = vrot.slane %v6395_v1, 5  ;;  %v208_v13 = vld [vmem:[%s6342_s25 + $0x2c] sm:$0x1] }
  0x24   : > { %v2074_v27 = vrot.slane %v2072_v14, 5  ;;  %v2059_v29 = vor.u32 %v2058_v20, %v2055_v12  ;;  %v6411_v30 = vrot.slane %v2779_v22, 4  ;;  %v273_v33 = vshrl.u32 %v176_v18, 16 }
  0x25   : > { %v276_v34 = vshll.u32 %v176_v18, 16  ;;  %v271_v35 = vsel %vm6368_vm4, %v266_v24, %v270_v5  ;;  %v2069_v36 = vor.u32 %v2068_v25, %v2064_v21  ;;  %v282_v38 = vshll.u32 %v177_v23, 16  ;;  %v5086_v24 = vld [vmem:[%s6342_s25 + $0x30] sm:$0xf] }
  0x26   : > { %v286_v39 = vshrl.u32 %v177_v23, 16  ;;  %v4900_v42 = vcombine.low %v261_v19, %v271_v35  ;;  %v2060_v43 = vrot.slane %v2059_v29, 4  ;;  %v275_v44 = vrot.slane %v273_v33, 4  ;;  %v6447_v33 = vld [vmem:[%s6342_s25 + $0x34] sm:$0xf] }
  0x27   : > { %v278_v45 = vrot.slane %v276_v34, 5  ;;  %v2070_v47 = vrot.slane %v2069_v36, 4  ;;  %v284_v48 = vrot.slane %v282_v38, 5  ;;  %v292_v50 = vshll.u32 %v207_v31, 16 }
  0x28   : > { %v288_v49 = vrot.slane %v286_v39, 4  ;;  %5594 = vmatmul.mubr.msk.bf16.vlgmr.msra.gmra.mrb[0].mxu1 %vm658_vm3, %v4900_v42  ;;  %v2065_v52 = vsel %vm6368_vm4, %v2060_v43, %v2064_v21  ;;  %v2077_v55 = vshrl.u32 %v5083_v40, 16  ;;  %v2080_v56 = vshll.u32 %v5083_v40, 16  ;;  %v6455_v40 = vld [vmem:[%s6342_s25 + $0x38] sm:$0x1] }
  0x29   : > { %v279_v53 = vor.u32 %v278_v45, %v275_v44  ;;  %5626 = vmatpush3.bf16.msra.mxu1 %v6355_v17  ;;  %v2075_v57 = vsel %vm6368_vm4, %v2070_v47, %v2074_v27  ;;  %v294_v59 = vrot.slane %v292_v50, 5  ;;  %v2086_v61 = vshll.u32 %v6418_v46, 16 }
  0x2a   : > { %v289_v58 = vor.u32 %v288_v49, %v284_v48  ;;  %v5127_v2 = vcombine.low %v2065_v52, %v2075_v57  ;;  %v2079_v5 = vrot.slane %v2077_v55, 4  ;;  %v2082_v6 = vrot.slane %v2080_v56, 5  ;;  %6157 = vmatprep.subr.msk.bf16.mxu1 %vm707_vm0, %v4979_v51  ;;  %v180_v52 = vld [vmem:[%s6342_s25 + $0x30] sm:$0xf] }
  0x2b   : > { %v280_v4 = vrot.slane %v279_v53, 4  ;;  %v2088_v9 = vrot.slane %v2086_v61, 5  ;;  %v2090_v17 = vshrl.u32 %v6418_v46, 16  ;;  %v2096_v10 = vshll.u32 %v6427_v54, 16 }
  0x2c   : > { %v290_v8 = vrot.slane %v289_v58, 4  ;;  %5730 = vmatmul.mubr.msk.bf16.vlgmr.msra.gmra.mrb[0].mxu0 %vm658_vm3, %v5127_v2  ;;  %v2083_v12 = vor.u32 %v2082_v6, %v2079_v5  ;;  %v297_v14 = vshrl.u32 %v178_v0, 16  ;;  %v300_v18 = vshll.u32 %v178_v0, 16  ;;  %v181_v58 = vld [vmem:[%s6342_s25 + $0x34] sm:$0xf] }
  0x2d   : > { %v285_v11 = vsel %vm6368_vm4, %v280_v4, %v284_v48  ;;  %5762 = vmatpush3.bf16.msra.mxu0 %v6374_v37  ;;  %v2092_v20 = vrot.slane %v2090_v17, 4  ;;  %v2098_v21 = vrot.slane %v2096_v10, 5  ;;  %v306_v23 = vshll.u32 %v179_v7, 16  ;;  %v209_v4 = vld [vmem:[%s6342_s25 + $0x38] sm:$0x1] }
  0x2e   : > { %v295_v19 = vsel %vm6368_vm4, %v290_v8, %v294_v59  ;;  %v2084_v27 = vrot.slane %v2083_v12, 4  ;;  %v299_v29 = vrot.slane %v297_v14, 4  ;;  %v302_v31 = vrot.slane %v300_v18, 5  ;;  %6162 = vmatprep.subr.msk.bf16.mxu0 %vm707_vm0, %v6361_v26  ;;  %v5089_v12 = vld [vmem:[%s6342_s25 + $0x3c] sm:$0xf] }
  0x2f   : > { %v4901_v25 = vcombine.low %v285_v11, %v295_v19  ;;  %v2093_v34 = vor.u32 %v2092_v20, %v2088_v9  ;;  %v308_v35 = vrot.slane %v306_v23, 5  ;;  %v310_v37 = vshrl.u32 %v179_v7, 16  ;;  %v6472_v20 = vld [vmem:[%s6342_s25 + $0x40] sm:$0xf] }
  0x30   : > { %v316_v36 = vshll.u32 %v208_v13, 16  ;;  %v2089_v38 = vsel %vm6368_vm4, %v2084_v27, %v2088_v9  ;;  %v303_v39 = vor.u32 %v302_v31, %v299_v29  ;;  %v2101_v42 = vshrl.u32 %v5086_v24, 16 }
  0x31   : > { %5597 = vmatprep.mubr.msk.bf16.mxu1 %vm658_vm3, %v4901_v25  ;;  %v2104_v43 = vshll.u32 %v5086_v24, 16  ;;  %v2094_v44 = vrot.slane %v2093_v34, 4  ;;  %v312_v45 = vrot.slane %v310_v37, 4  ;;  %v2110_v26 = vshll.u32 %v6447_v33, 16  ;;  %v6477_v34 = vld [vmem:[%s6342_s25 + $0x44] sm:$0x1] }
  0x32   : > { %v318_v47 = vrot.slane %v316_v36, 5  ;;  %v304_v48 = vrot.slane %v303_v39, 4  ;;  %v2103_v49 = vrot.slane %v2101_v42, 4  ;;  %v2114_v51 = vshrl.u32 %v6447_v33, 16  ;;  %v182_v42 = vld [vmem:[%s6342_s25 + $0x3c] sm:$0xf] }
  0x33   : > { %v2106_v50 = vrot.slane %v2104_v43, 5  ;;  %v2099_v53 = vsel %vm6368_vm4, %v2094_v44, %v2098_v21  ;;  %v313_v55 = vor.u32 %v312_v45, %v308_v35  ;;  %v2112_v56 = vrot.slane %v2110_v26, 5  ;;  %v183_v26 = vld [vmem:[%s6342_s25 + $0x40] sm:$0xf] }
  0x34   : > { %v2120_v57 = vshll.u32 %v6455_v40, 16  ;;  %v5128_v59 = vcombine.low %v2089_v38, %v2099_v53  ;;  %v309_v61 = vsel %vm6368_vm4, %v304_v48, %v308_v35  ;;  %v2116_v2 = vrot.slane %v2114_v51, 4 }
  0x35   : > { %v2107_v0 = vor.u32 %v2106_v50, %v2103_v49  ;;  %v314_v5 = vrot.slane %v313_v55, 4  ;;  %v321_v7 = vshrl.u32 %v180_v52, 16  ;;  %v324_v8 = vshll.u32 %v180_v52, 16 }
  0x36   : > { %v2122_v6 = vrot.slane %v2120_v57, 5  ;;  %5733 = vmatprep.mubr.msk.bf16.mxu0 %vm658_vm3, %v5128_v59  ;;  %v2117_v17 = vor.u32 %v2116_v2, %v2112_v56  ;;  %v330_v10 = vshll.u32 %v181_v58, 16  ;;  %v334_v11 = vshrl.u32 %v181_v58, 16  ;;  %v5092_v2 = vld [vmem:[%s6342_s25 + $0x48] sm:$0xf] }
  0x37   : > { %v2108_v9 = vrot.slane %v2107_v0, 4  ;;  %v319_v13 = vsel %vm6368_vm4, %v314_v5, %v318_v47  ;;  %v323_v14 = vrot.slane %v321_v7, 4  ;;  %v326_v18 = vrot.slane %v324_v8, 5  ;;  %v6495_v8 = vld [vmem:[%s6342_s25 + $0x4c] sm:$0xf] }
  0x38   : > { %v340_v19 = vshll.u32 %v209_v4, 16  ;;  %v4902_v21 = vcombine.low %v309_v61, %v319_v13  ;;  %v2118_v24 = vrot.slane %v2117_v17, 4  ;;  %v332_v25 = vrot.slane %v330_v10, 5  ;;  %v210_v61 = vld [vmem:[%s6342_s25 + $0x44] sm:$0x1] }
  0x39   : > { %v2113_v23 = vsel %vm6368_vm4, %v2108_v9, %v2112_v56  ;;  %v327_v27 = vor.u32 %v326_v18, %v323_v14  ;;  %v336_v29 = vrot.slane %v334_v11, 4  ;;  %v2125_v35 = vshrl.u32 %v5089_v12, 16 }
  0x3a   : > { %v342_v31 = vrot.slane %v340_v19, 5  ;;  %5598 = vmatmul.mubr.msk.bf16.gmra.mrb[4].mxu1 %vm658_vm3, %v4902_v21  ;;  %v2123_v37 = vsel %vm6368_vm4, %v2118_v24, %v2122_v6  ;;  %v2128_v36 = vshll.u32 %v5089_v12, 16  ;;  %v2134_v38 = vshll.u32 %v6472_v20, 16 }
  0x3b   : > { %v2138_v39 = vshrl.u32 %v6472_v20, 16  ;;  %v5129_v43 = vcombine.low %v2113_v23, %v2123_v37  ;;  %v328_v44 = vrot.slane %v327_v27, 4  ;;  %v337_v45 = vor.u32 %v336_v29, %v332_v25  ;;  %v6503_v23 = vld [vmem:[%s6342_s25 + $0x50] sm:$0x1]  ;;  %v6507_v27 = vld [vmem:[%s6342_s25 + $0x48] sm:$0xf] }
  0x3c   : > { %v2127_v47 = vrot.slane %v2125_v35, 4  ;;  %v2130_v48 = vrot.slane %v2128_v36, 5  ;;  %v2136_v49 = vrot.slane %v2134_v38, 5  ;;  %v2144_v51 = vshll.u32 %v6477_v34, 16  ;;  %v6510_v36 = vld [vmem:[%s6342_s25 + $0x4c] sm:$0xf] }
  0x3d   : > { %v2140_v50 = vrot.slane %v2138_v39, 4  ;;  %5734 = vmatmul.mubr.msk.bf16.gmra.mrb[4].mxu0 %vm658_vm3, %v5129_v43  ;;  %v333_v52 = vsel %vm6368_vm4, %v328_v44, %v332_v25  ;;  %v338_v53 = vrot.slane %v337_v45, 4  ;;  %v345_v55 = vshrl.u32 %v182_v42, 16 }
  0x3e   : > { %v348_v56 = vshll.u32 %v182_v42, 16  ;;  %v2131_v57 = vor.u32 %v2130_v48, %v2127_v47  ;;  %v2146_v59 = vrot.slane %v2144_v51, 5  ;;  %v354_v0 = vshll.u32 %v183_v26, 16 }
  0x3f   : > { %v2141_v58 = vor.u32 %v2140_v50, %v2136_v49  ;;  %v343_v4 = vsel %vm6368_vm4, %v338_v53, %v342_v31  ;;  %v347_v5 = vrot.slane %v345_v55, 4  ;;  %v358_v7 = vshrl.u32 %v183_v26, 16  ;;  %v211_v26 = vld [vmem:[%s6342_s25 + $0x50] sm:$0x1]  ;;  %v5095_v53 = vld [vmem:[%s6342_s25 + $0x54] sm:$0xf] }
  0x40   : > { %v350_v6 = vrot.slane %v348_v56, 5  ;;  %v4903_v9 = vcombine.low %v333_v52, %v343_v4  ;;  %v2132_v17 = vrot.slane %v2131_v57, 4  ;;  %v356_v11 = vrot.slane %v354_v0, 5  ;;  %v6526_v4 = vld [vmem:[%s6342_s25 + $0x58] sm:$0xf] }
  0x41   : > { %v2142_v10 = vrot.slane %v2141_v58, 4  ;;  %v360_v13 = vrot.slane %v358_v7, 4  ;;  %v364_v14 = vshll.u32 %v210_v61, 16  ;;  %v2149_v18 = vshrl.u32 %v5092_v2, 16 }
  0x42   : > { %v351_v12 = vor.u32 %v350_v6, %v347_v5  ;;  %5601 = vmatprep.mubr.msk.bf16.mxu1 %vm658_vm3, %v4903_v9  ;;  %v2137_v19 = vsel %vm6368_vm4, %v2132_v17, %v2136_v49  ;;  %v2152_v24 = vshll.u32 %v5092_v2, 16  ;;  %v2158_v25 = vshll.u32 %v6495_v8, 16 }
  0x43   : > { %v2147_v21 = vsel %vm6368_vm4, %v2142_v10, %v2146_v59  ;;  %v361_v35 = vor.u32 %v360_v13, %v356_v11  ;;  %v366_v37 = vrot.slane %v364_v14, 5  ;;  %v2151_v38 = vrot.slane %v2149_v18, 4 }
  0x44   : > { %v5130_v29 = vcombine.low %v2137_v19, %v2147_v21  ;;  %v352_v31 = vrot.slane %v351_v12, 4  ;;  %v2154_v39 = vrot.slane %v2152_v24, 5  ;;  %v2160_v42 = vrot.slane %v2158_v25, 5  ;;  %v6532_v12 = vld [vmem:[%s6342_s25 + $0x5c] sm:$0x1] }
  0x45   : > { %v2162_v43 = vshrl.u32 %v6495_v8, 16  ;;  %v362_v45 = vrot.slane %v361_v35, 4  ;;  %v2168_v47 = vshll.u32 %v6503_v23, 16  ;;  %v369_v48 = vshrl.u32 %v6507_v27, 16  ;;  %v6536_v24 = vld [vmem:[%s6342_s25 + $0x54] sm:$0xf] }
  0x46   : > { %5737 = vmatprep.mubr.msk.bf16.mxu0 %vm658_vm3, %v5130_v29  ;;  %v357_v44 = vsel %vm6368_vm4, %v352_v31, %v356_v11  ;;  %v2155_v49 = vor.u32 %v2154_v39, %v2151_v38  ;;  %v372_v51 = vshll.u32 %v6507_v27, 16  ;;  %v378_v52 = vshll.u32 %v6510_v36, 16 }
  0x47   : > { %v2164_v50 = vrot.slane %v2162_v43, 4  ;;  %v367_v55 = vsel %vm6368_vm4, %v362_v45, %v366_v37  ;;  %v2170_v56 = vrot.slane %v2168_v47, 5  ;;  %v371_v57 = vrot.slane %v369_v48, 4  ;;  %v6542_v37 = vld [vmem:[%s6342_s25 + $0x58] sm:$0xf] }
  0x48   : > { %v382_v58 = vshrl.u32 %v6510_v36, 16  ;;  %v4904_v59 = vcombine.low %v357_v44, %v367_v55  ;;  %v2156_v61 = vrot.slane %v2155_v49, 4  ;;  %v374_v2 = vrot.slane %v372_v51, 5 }
  0x49   : > { %v2165_v0 = vor.u32 %v2164_v50, %v2160_v42  ;;  %v380_v5 = vrot.slane %v378_v52, 5  ;;  %v388_v7 = vshll.u32 %v211_v26, 16  ;;  %v2173_v9 = vshrl.u32 %v5095_v53, 16  ;;  %v212_v26 = vld [vmem:[%s6342_s25 + $0x5c] sm:$0x1] }
  0x4a   : > { %v384_v6 = vrot.slane %v382_v58, 4  ;;  %5602 = vmatmul.mubr.msk.bf16.gmra.mrb[8].mxu1 %vm658_vm3, %v4904_v59  ;;  %v2161_v17 = vsel %vm6368_vm4, %v2156_v61, %v2160_v42  ;;  %v375_v11 = vor.u32 %v374_v2, %v371_v57  ;;  %v2176_v13 = vshll.u32 %v5095_v53, 16  ;;  %v5098_v53 = vld [vmem:[%s6342_s25 + $0x60] sm:$0xf]  ;;  %v6556_v59 = vld [vmem:[%s6342_s25 + $0x64] sm:$0xf] }
  0x4b   : > { %v2166_v10 = vrot.slane %v2165_v0, 4  ;;  %v390_v18 = vrot.slane %v388_v7, 5  ;;  %v2175_v19 = vrot.slane %v2173_v9, 4  ;;  %v2182_v21 = vshll.u32 %v6526_v4, 16  ;;  %v6563_v9 = vld [vmem:[%s6342_s25 + $0x68] sm:$0x1] }
  0x4c   : > { %v385_v14 = vor.u32 %v384_v6, %v380_v5  ;;  %v376_v29 = vrot.slane %v375_v11, 4  ;;  %v2178_v31 = vrot.slane %v2176_v13, 5  ;;  %v2186_v35 = vshrl.u32 %v6526_v4, 16 }
  0x4d   : > { %v2171_v25 = vsel %vm6368_vm4, %v2166_v10, %v2170_v56  ;;  %v2184_v42 = vrot.slane %v2182_v21, 5  ;;  %v2192_v43 = vshll.u32 %v6532_v12, 16  ;;  %v393_v48 = vshrl.u32 %v6536_v24, 16 }
  0x4e   : > { %v5131_v38 = vcombine.low %v2161_v17, %v2171_v25  ;;  %v386_v39 = vrot.slane %v385_v14, 4  ;;  %v381_v44 = vsel %vm6368_vm4, %v376_v29, %v380_v5  ;;  %v2179_v45 = vor.u32 %v2178_v31, %v2175_v19  ;;  %v6567_v19 = vld [vmem:[%s6342_s25 + $0x60] sm:$0xf] }
  0x4f   : > { %v2188_v47 = vrot.slane %v2186_v35, 4  ;;  %v2194_v50 = vrot.slane %v2192_v43, 5  ;;  %v396_v51 = vshll.u32 %v6536_v24, 16  ;;  %v402_v52 = vshll.u32 %v6542_v37, 16  ;;  %v6573_v35 = vld [vmem:[%s6342_s25 + $0x64] sm:$0xf] }
  0x50   : > { %5738 = vmatmul.mubr.msk.bf16.gmra.mrb[8].mxu0 %vm658_vm3, %v5131_v38  ;;  %v391_v49 = vsel %vm6368_vm4, %v386_v39, %v390_v18  ;;  %v2180_v56 = vrot.slane %v2179_v45, 4  ;;  %v395_v58 = vrot.slane %v393_v48, 4  ;;  %v406_v2 = vshrl.u32 %v6542_v37, 16 }
  0x51   : > { %v4905_v55 = vcombine.low %v381_v44, %v391_v49  ;;  %v2189_v57 = vor.u32 %v2188_v47, %v2184_v42  ;;  %v398_v61 = vrot.slane %v396_v51, 5  ;;  %v404_v0 = vrot.slane %v402_v52, 5 }
  0x52   : > { %v412_v5 = vshll.u32 %v212_v26, 16  ;;  %v2185_v6 = vsel %vm6368_vm4, %v2180_v56, %v2184_v42  ;;  %v2197_v17 = vshrl.u32 %v5098_v53, 16  ;;  %v2200_v10 = vshll.u32 %v5098_v53, 16 }
  0x53   : > { %5605 = vmatprep.mubr.msk.bf16.mxu1 %vm658_vm3, %v4905_v55  ;;  %v2190_v7 = vrot.slane %v2189_v57, 4  ;;  %v399_v11 = vor.u32 %v398_v61, %v395_v58  ;;  %v408_v13 = vrot.slane %v406_v2, 4  ;;  %v2206_v18 = vshll.u32 %v6556_v59, 16  ;;  %v5158_v58 = vld [vmem:[%s6342_s25 + $0xc] sm:$0xe] }
  0x54   : > { %v414_v14 = vrot.slane %v412_v5, 5  ;;  %v2199_v25 = vrot.slane %v2197_v17, 4  ;;  %v2202_v29 = vrot.slane %v2200_v10, 5  ;;  %v2210_v31 = vshrl.u32 %v6556_v59, 16 }
  0x55   : > { %v2195_v21 = vsel %vm6368_vm4, %v2190_v7, %v2194_v50  ;;  %v400_v39 = vrot.slane %v399_v11, 4  ;;  %v409_v42 = vor.u32 %v408_v13, %v404_v0  ;;  %v2208_v43 = vrot.slane %v2206_v18, 5  ;;  %v213_v50 = vld [vmem:[%s6342_s25 + $0x68] sm:$0x1] }
  0x56   : > { %v5132_v38 = vcombine.low %v2185_v6, %v2195_v21  ;;  %v2203_v44 = vor.u32 %v2202_v29, %v2199_v25  ;;  %v2212_v45 = vrot.slane %v2210_v31, 4  ;;  %v2216_v47 = vshll.u32 %v6563_v9, 16  ;;  %v6601_v29 = vld [vmem:[%s6342_s25 + $0x70] sm:$0xf] }
  0x57   : > { %v417_v26 = vshrl.u32 %v6567_v19, 16  ;;  %v405_v48 = vsel %vm6368_vm4, %v400_v39, %v404_v0  ;;  %v410_v49 = vrot.slane %v409_v42, 4  ;;  %v420_v51 = vshll.u32 %v6567_v19, 16  ;;  %v6588_v0 = vld [vmem:[%s6342_s25 + $0x6c] sm:$0xf] }
  0x58   : > { %5741 = vmatprep.mubr.msk.bf16.mxu0 %vm658_vm3, %v5132_v38  ;;  %v426_v52 = vshll.u32 %v6573_v35, 16  ;;  %v2204_v53 = vrot.slane %v2203_v44, 4  ;;  %v2213_v55 = vor.u32 %v2212_v45, %v2208_v43  ;;  %v2218_v56 = vrot.slane %v2216_v47, 5 }
  0x59   : > { %v419_v57 = vrot.slane %v417_v26, 4  ;;  %v415_v61 = vsel %vm6368_vm4, %v410_v49, %v414_v14  ;;  %v422_v2 = vrot.slane %v420_v51, 5  ;;  %v430_v6 = vshrl.u32 %v6573_v35, 16  ;;  %v214_v26 = vld [vmem:[%s6342_s25 + $0x74] sm:$0x1] }
  0x5a   : > { %v428_v5 = vrot.slane %v426_v52, 5  ;;  %v4906_v7 = vcombine.low %v405_v48, %v415_v61  ;;  %v2209_v17 = vsel %vm6368_vm4, %v2204_v53, %v2208_v43  ;;  %v2214_v10 = vrot.slane %v2213_v55, 4  ;;  %v5159_v48 = vld [vmem:[%s6342_s25 + $0x18] sm:$0xe] }
  0x5b   : > { %v436_v11 = vshll.u32 %v213_v50, 16  ;;  %v423_v14 = vor.u32 %v422_v2, %v419_v57  ;;  %v432_v18 = vrot.slane %v430_v6, 4  ;;  %v5174_v21 = vrot.slane %v5158_v58, 9  ;;  %v6620_v53 = vld [vmem:[%s6342_s25 + $0x78] sm:$0xf] }
  0x5c   : > { %v2774_v25 = vrot.slane %v2772_v62, 4  ;;  %5606 = vmatmul.mubr.msk.bf16.gmra.mrb[12].mxu1 %vm658_vm3, %v4906_v7  ;;  %v2219_v31 = vsel %vm6368_vm4, %v2214_v10, %v2218_v56  ;;  %v441_v39 = vshrl.u32 %v6588_v0, 16  ;;  %v444_v42 = vshll.u32 %v6588_v0, 16  ;;  %v215_v57 = vld [vmem:[%s6342_s25 + $0x80] sm:$0x1] }
  0x5d   : > { %v438_v38 = vrot.slane %v436_v11, 5  ;;  %v5133_v43 = vcombine.low %v2209_v17, %v2219_v31  ;;  %v424_v44 = vrot.slane %v423_v14, 4  ;;  %v433_v45 = vor.u32 %v432_v18, %v428_v5  ;;  %v5160_v10 = vld [vmem:[%s6342_s25 + $0x24] sm:$0xe] }
  0x5e   : > { %v2773_v47 = vsel %vm6594_vm7, %v5174_v21, %v2772_v62  ;;  %v2776_v49 = vsel %vm6594_vm7, %v2774_v25, %v2775_v63  ;;  %v443_v50 = vrot.slane %v441_v39, 4  ;;  %v446_v51 = vrot.slane %v444_v42, 5  ;;  %v6646_v39 = vld [vmem:[%s6342_s25 + $0x84] sm:$0xf] }
  0x5f   : > { %v450_v52 = vshll.u32 %v6601_v29, 16  ;;  %5742 = vmatmul.mubr.msk.bf16.gmra.mrb[12].mxu0 %vm658_vm3, %v5133_v43  ;;  %v429_v15 = vsel %vm6368_vm4, %v424_v44, %v428_v5  ;;  %v434_v62 = vrot.slane %v433_v45, 4  ;;  %v5191_v55 = vcombine.low %v2773_v47, %v2776_v49  ;;  %v6654_v43 = vld [vmem:[%s6342_s25 + $0x88] sm:$0xf] }
  0x60   : > { %v454_v56 = vshrl.u32 %v6601_v29, 16  ;;  %v447_v63 = vor.u32 %v446_v51, %v443_v50  ;;  %v460_v61 = vshll.u32 %v214_v26, 16  ;;  %v5175_v2 = vrot.slane %v5159_v48, 9 }
  0x61   : > { %v452_v58 = vrot.slane %v450_v52, 5  ;;  %v439_v6 = vsel %vm6368_vm4, %v434_v62, %v438_v38  ;;  %5763 = vmatprep.mubr.msk.bf16.mxu0 %vm658_vm3, %v5191_v55  ;;  %v2783_v5 = vsel %vm6594_vm7, %v6411_v30, %v2782_v28  ;;  %v465_v17 = vshrl.u32 %v6620_v53, 16  ;;  %v216_v52 = vld [vmem:[%s6342_s25 + $0x8c] sm:$0x1] }
  0x62   : > { %v456_v7 = vrot.slane %v454_v56, 4  ;;  %v4907_v11 = vcombine.low %v429_v15, %v439_v6  ;;  %v448_v14 = vrot.slane %v447_v63, 4  ;;  %v462_v18 = vrot.slane %v460_v61, 5 }
  0x63   : > { %v2780_v21 = vsel %vm6594_vm7, %v5175_v2, %v2779_v22  ;;  %v467_v38 = vrot.slane %v465_v17, 4  ;;  %v468_v1 = vshll.u32 %v6620_v53, 16  ;;  %v474_v30 = vshll.u32 %v6627_v16, 16  ;;  %v6659_v22 = vld [vmem:[%s8141_s1 + $0xe] sm:$0x3] }
  0x64   : > { %v457_v25 = vor.u32 %v456_v7, %v452_v58  ;;  %v5192_v31 = vcombine.low %v2780_v21, %v2783_v5  ;;  %5609 = vmatprep.mubr.msk.bf16.mxu1 %vm658_vm3, %v4907_v11  ;;  %v453_v28 = vsel %vm6368_vm4, %v448_v14, %v452_v58  ;;  %v478_v60 = vshrl.u32 %v6627_v16, 16  ;;  %v6678_v5 = vld [vmem:[%s6342_s25 + $0x90] sm:$0xf] }
  0x65   : > { %v484_v42 = vshll.u32 %v215_v57, 16  ;;  %v470_v45 = vrot.slane %v468_v1, 5  ;;  %v5176_v47 = vrot.slane %v5160_v10, 9  ;;  %v2786_v26 = vrot.slane %v6418_v46, 5  ;;  %v5161_v57 = vld [vmem:[%s6342_s25 + $0x30] sm:$0xe] }
  0x66   : > { %v458_v44 = vrot.slane %v457_v25, 4  ;;  %v476_v48 = vrot.slane %v474_v30, 5  ;;  %v480_v49 = vrot.slane %v478_v60, 4  ;;  %v2789_v51 = vrot.slane %v6427_v54, 5  ;;  %v6690_v30 = vld [vmem:[%s6342_s25 + $0x94] sm:$0xf] }
  0x67   : > { %v486_v50 = vrot.slane %v484_v42, 5  ;;  %5764 = vmatmul.mubr.msk.bf16.vlgmr.msra.gmra.mrb[0].mxu0 %vm658_vm3, %v5192_v31  ;;  %v471_v62 = vor.u32 %v470_v45, %v467_v38  ;;  %v2787_v55 = vsel %vm6594_vm7, %v5176_v47, %v2786_v26  ;;  %v2788_v56 = vrot.slane %v2786_v26, 4  ;;  %v217_v60 = vld [vmem:[%s6342_s25 + $0x98] sm:$0x1]  ;;  %v5162_v26 = vld [vmem:[%s6342_s25 + $0x3c] sm:$0xe] }
  0x68   : > { %v463_v15 = vsel %vm6368_vm4, %v458_v44, %v462_v18  ;;  %5796 = vmatpush3.bf16.msra.mxu0 %v6378_v41  ;;  %v481_v46 = vor.u32 %v480_v49, %v476_v48  ;;  %v489_v58 = vshrl.u32 %v6646_v39, 16  ;;  %v492_v54 = vshll.u32 %v6646_v39, 16 }
  0x69   : > { %v4908_v63 = vcombine.low %v453_v28, %v463_v15  ;;  %v472_v61 = vrot.slane %v471_v62, 4  ;;  %v2790_v2 = vsel %vm6594_vm7, %v2788_v56, %v2789_v51  ;;  %v498_v6 = vshll.u32 %v6654_v43, 16  ;;  %6163 = vmatprep.subr.msk.bf16.mxu0 %vm707_vm0, %v6659_v22 }
  0x6a   : > { %v502_v7 = vshrl.u32 %v6654_v43, 16  ;;  %v482_v41 = vrot.slane %v481_v46, 4  ;;  %v5193_v17 = vcombine.low %v2787_v55, %v2790_v2  ;;  %v491_v10 = vrot.slane %v489_v58, 4  ;;  %v6710_v46 = vld [vmem:[%s6342_s25 + $0xa0] sm:$0xf] }
  0x6b   : > { %5610 = vmatmul.mubr.msk.bf16.gmra.mrb[16].mxu1 %vm658_vm3, %v4908_v63  ;;  %v494_v11 = vrot.slane %v492_v54, 5  ;;  %v477_v14 = vsel %vm6368_vm4, %v472_v61, %v476_v48  ;;  %v500_v18 = vrot.slane %v498_v6, 5  ;;  %v508_v25 = vshll.u32 %v216_v52, 16  ;;  %v6699_v52 = vld [vmem:[%s6342_s25 + $0x9c] sm:$0xf] }
  0x6c   : > { %v504_v21 = vrot.slane %v502_v7, 4  ;;  %v487_v31 = vsel %vm6368_vm4, %v482_v41, %v486_v50  ;;  %5767 = vmatprep.mubr.msk.bf16.mxu0 %vm658_vm3, %v5193_v17  ;;  %v5177_v1 = vrot.slane %v5161_v57, 9  ;;  %v2793_v28 = vrot.slane %v6447_v33, 5 }
  0x6d   : > { %v495_v38 = vor.u32 %v494_v11, %v491_v10  ;;  %v4909_v42 = vcombine.low %v477_v14, %v487_v31  ;;  %v510_v45 = vrot.slane %v508_v25, 5  ;;  %v2796_v47 = vrot.slane %v6455_v40, 5  ;;  %v218_v10 = vld [vmem:[%s6342_s25 + $0xa4] sm:$0x1]  ;;  %v5163_v11 = vld [vmem:[%s6342_s25 + $0x48] sm:$0xe] }
  0x6e   : > { %v505_v44 = vor.u32 %v504_v21, %v500_v18  ;;  %v2794_v49 = vsel %vm6594_vm7, %v5177_v1, %v2793_v28  ;;  %v2795_v50 = vrot.slane %v2793_v28, 4  ;;  %v513_v51 = vshrl.u32 %v6678_v5, 16 }
  0x6f   : > { %v496_v48 = vrot.slane %v495_v38, 4  ;;  %5613 = vmatprep.mubr.msk.bf16.mxu1 %vm658_vm3, %v4909_v42  ;;  %v516_v15 = vshll.u32 %v6678_v5, 16  ;;  %v522_v62 = vshll.u32 %v6690_v30, 16  ;;  %v526_v40 = vshrl.u32 %v6690_v30, 16 }
  0x70   : > { %v506_v33 = vrot.slane %v505_v44, 4  ;;  %v2797_v56 = vsel %vm6594_vm7, %v2795_v50, %v2796_v47  ;;  %v515_v57 = vrot.slane %v513_v51, 4  ;;  %v532_v63 = vshll.u32 %v217_v60, 16 }
  0x71   : > { %v501_v55 = vsel %vm6368_vm4, %v496_v48, %v500_v18  ;;  %v5194_v54 = vcombine.low %v2794_v49, %v2797_v56  ;;  %v518_v61 = vrot.slane %v516_v15, 5  ;;  %v524_v2 = vrot.slane %v522_v62, 5  ;;  %v6736_v56 = vld [vmem:[%s6342_s25 + $0xac] sm:$0xf] }
  0x72   : > { %v511_v58 = vsel %vm6368_vm4, %v506_v33, %v510_v45  ;;  %v528_v7 = vrot.slane %v526_v40, 4  ;;  %v534_v41 = vrot.slane %v532_v63, 5  ;;  %v5178_v17 = vrot.slane %v5162_v26, 9  ;;  %v6731_v33 = vld [vmem:[%s6342_s25 + $0xa8] sm:$0xf] }
  0x73   : > { %v4910_v6 = vcombine.low %v501_v55, %v511_v58  ;;  %5768 = vmatmul.mubr.msk.bf16.gmra.mrb[4].mxu0 %vm658_vm3, %v5194_v54  ;;  %v519_v14 = vor.u32 %v518_v61, %v515_v57  ;;  %v2800_v18 = vrot.slane %v6472_v20, 5  ;;  %v2803_v21 = vrot.slane %v6477_v34, 5  ;;  %v219_v61 = vld [vmem:[%s6342_s25 + $0xb0] sm:$0x1] }
  0x74   : > { %v537_v25 = vshrl.u32 %v6699_v52, 16  ;;  %v529_v31 = vor.u32 %v528_v7, %v524_v2  ;;  %v540_v38 = vshll.u32 %v6699_v52, 16  ;;  %v546_v1 = vshll.u32 %v6710_v46, 16 }
  0x75   : > { %5614 = vmatmul.mubr.msk.bf16.gmra.mrb[20].mxu1 %vm658_vm3, %v4910_v6  ;;  %v550_v28 = vshrl.u32 %v6710_v46, 16  ;;  %v520_v60 = vrot.slane %v519_v14, 4  ;;  %v2801_v42 = vsel %vm6594_vm7, %v5178_v17, %v2800_v18  ;;  %v2802_v20 = vrot.slane %v2800_v18, 4  ;;  %v6751_v14 = vld [vmem:[%s6342_s25 + $0xb4] sm:$0xf] }
  0x76   : > { %v539_v44 = vrot.slane %v537_v25, 4  ;;  %v530_v34 = vrot.slane %v529_v31, 4  ;;  %v542_v45 = vrot.slane %v540_v38, 5  ;;  %v548_v47 = vrot.slane %v546_v1, 5 }
  0x77   : > { %v552_v26 = vrot.slane %v550_v28, 4  ;;  %v525_v48 = vsel %vm6368_vm4, %v520_v60, %v524_v2  ;;  %v2804_v49 = vsel %vm6594_vm7, %v2802_v20, %v2803_v21  ;;  %v556_v50 = vshll.u32 %v218_v10, 16  ;;  %v5164_v2 = vld [vmem:[%s6342_s25 + $0x54] sm:$0xe] }
  0x78   : > { %v5179_v51 = vrot.slane %v5163_v11, 9  ;;  %v535_v15 = vsel %vm6368_vm4, %v530_v34, %v534_v41  ;;  %v5195_v62 = vcombine.low %v2801_v42, %v2804_v49  ;;  %v543_v40 = vor.u32 %v542_v45, %v539_v44  ;;  %v6760_v42 = vld [vmem:[%s6342_s25 + $0xb8] sm:$0xf]  ;;  %v220_v49 = vld [vmem:[%s6342_s25 + $0xbc] sm:$0x1] }
  0x79   : > { %v553_v55 = vor.u32 %v552_v26, %v548_v47  ;;  %v4911_v57 = vcombine.low %v525_v48, %v535_v15  ;;  %v558_v63 = vrot.slane %v556_v50, 5  ;;  %v2807_v58 = vrot.slane %v6495_v8, 5 }
  0x7a   : > { %v2810_v54 = vrot.slane %v6503_v23, 5  ;;  %5771 = vmatprep.mubr.msk.bf16.mxu0 %vm658_vm3, %v5195_v62  ;;  %v544_v6 = vrot.slane %v543_v40, 4  ;;  %v561_v41 = vshrl.u32 %v6731_v33, 16  ;;  %v564_v17 = vshll.u32 %v6731_v33, 16 }
  0x7b   : > { %v554_v7 = vrot.slane %v553_v55, 4  ;;  %5617 = vmatprep.mubr.msk.bf16.mxu1 %vm658_vm3, %v4911_v57  ;;  %v2808_v10 = vsel %vm6594_vm7, %v5179_v51, %v2807_v58  ;;  %v2809_v11 = vrot.slane %v2807_v58, 4  ;;  %v570_v8 = vshll.u32 %v6736_v56, 16  ;;  %v5165_v55 = vld [vmem:[%s6342_s25 + $0x60] sm:$0xe] }
  0x7c   : > { %v574_v23 = vshrl.u32 %v6736_v56, 16  ;;  %v549_v18 = vsel %vm6368_vm4, %v544_v6, %v548_v47  ;;  %v563_v25 = vrot.slane %v561_v41, 4  ;;  %v566_v31 = vrot.slane %v564_v17, 5  ;;  %v5166_v6 = vld [vmem:[%s6342_s25 + $0x6c] sm:$0xe] }
  0x7d   : > { %v559_v21 = vsel %vm6368_vm4, %v554_v7, %v558_v63  ;;  %v2811_v1 = vsel %vm6594_vm7, %v2809_v11, %v2810_v54  ;;  %v572_v28 = vrot.slane %v570_v8, 5  ;;  %v580_v34 = vshll.u32 %v219_v61, 16  ;;  %v5102_v11 = vld [vmem:[%s6342_s25 + $0x70] sm:$0xf]  ;;  %v5103_v8 = vld [vmem:[%s6342_s25 + $0x74] sm:$0x1] }
  0x7e   : > { %v4912_v38 = vcombine.low %v549_v18, %v559_v21  ;;  %v576_v60 = vrot.slane %v574_v23, 4  ;;  %v5196_v20 = vcombine.low %v2808_v10, %v2811_v1  ;;  %v567_v44 = vor.u32 %v566_v31, %v563_v25 }
  0x7f   : > { %v5180_v45 = vrot.slane %v5164_v2, 9  ;;  %v2814_v26 = vrot.slane %v6526_v4, 5  ;;  %v2817_v48 = vrot.slane %v6532_v12, 5  ;;  %v585_v50 = vshrl.u32 %v6751_v14, 16 }
  0x80   : > { %5618 = vmatmul.mubr.msk.bf16.gmra.mrb[24].mxu1 %vm658_vm3, %v4912_v38  ;;  %v577_v47 = vor.u32 %v576_v60, %v572_v28  ;;  %5772 = vmatmul.mubr.msk.bf16.gmra.mrb[8].mxu0 %vm658_vm3, %v5196_v20  ;;  %v568_v51 = vrot.slane %v567_v44, 4  ;;  %v582_v15 = vrot.slane %v580_v34, 5  ;;  %v588_v62 = vshll.u32 %v6751_v14, 16 }
  0x81   : > { %v594_v40 = vshll.u32 %v6760_v42, 16  ;;  %v2815_v4 = vsel %vm6594_vm7, %v5180_v45, %v2814_v26  ;;  %v2816_v12 = vrot.slane %v2814_v26, 4  ;;  %v587_v63 = vrot.slane %v585_v50, 4 }
  0x82   : > { %v578_v57 = vrot.slane %v577_v47, 4  ;;  %v573_v58 = vsel %vm6368_vm4, %v568_v51, %v572_v28  ;;  %v590_v54 = vrot.slane %v588_v62, 5  ;;  %v598_v2 = vshrl.u32 %v6760_v42, 16  ;;  %v5167_v47 = vld [vmem:[%s6342_s25 + $0x78] sm:$0xe] }
  0x83   : > { %v596_v61 = vrot.slane %v594_v40, 5  ;;  %v2818_v41 = vsel %vm6594_vm7, %v2816_v12, %v2817_v48  ;;  %v604_v17 = vshll.u32 %v220_v49, 16  ;;  %v5181_v10 = vrot.slane %v5165_v55, 9  ;;  %v6222_v51 = vld [vmem:[%s6342_s25] sm:$0xf] }
  0x84   : > { %v583_v7 = vsel %vm6368_vm4, %v578_v57, %v582_v15  ;;  %v5197_v18 = vcombine.low %v2815_v4, %v2818_v41  ;;  %v591_v21 = vor.u32 %v590_v54, %v587_v63  ;;  %v600_v25 = vrot.slane %v598_v2, 4  ;;  %v6798_v15 = vld [vmem:[%s6342_s25 + $0x4] sm:$0xf]  ;;  %v6802_v40 = vld [vmem:[%s6342_s25 + $0x7c] sm:$0xf] }
  0x85   : > { %v4913_v23 = vcombine.low %v573_v58, %v583_v7  ;;  %v606_v31 = vrot.slane %v604_v17, 5  ;;  %v2821_v38 = vrot.slane %v6556_v59, 5  ;;  %v2824_v1 = vrot.slane %v6563_v9, 5  ;;  %v6805_v55 = vld [vmem:[%s6342_s25 + $0x80] sm:$0x1] }
  0x86   : > { %v5182_v28 = vrot.slane %v5166_v6, 9  ;;  %5775 = vmatprep.mubr.msk.bf16.mxu0 %vm658_vm3, %v5197_v18  ;;  %v592_v60 = vrot.slane %v591_v21, 4  ;;  %v601_v20 = vor.u32 %v600_v25, %v596_v61  ;;  %v2828_v44 = vrot.slane %v5102_v11, 5  ;;  %v5108_v57 = vld [vmem:[%s6342_s25 + $0x88] sm:$0xf] }
  0x87   : > { %5621 = vmatprep.mubr.msk.bf16.mxu1 %vm658_vm3, %v4913_v23  ;;  %v2831_v34 = vrot.slane %v5103_v8, 5  ;;  %v2822_v45 = vsel %vm6594_vm7, %v5181_v10, %v2821_v38  ;;  %v2823_v59 = vrot.slane %v2821_v38, 4  ;;  %v4931_v62 = vcombine.low %v6222_v51, %v6798_v15  ;;  %v5109_v54 = vld [vmem:[%s6342_s25 + $0x8c] sm:$0x1]  ;;  %v5111_v17 = vld [vmem:[%s6342_s25 + $0x94] sm:$0xf] }
  0x88   : > { %v597_v9 = vsel %vm6368_vm4, %v592_v60, %v596_v61  ;;  %v602_v26 = vrot.slane %v601_v20, 4  ;;  %v2829_v48 = vsel %vm6594_vm7, %v5182_v28, %v2828_v44  ;;  %v2830_v49 = vrot.slane %v2828_v44, 4  ;;  %v5168_v61 = vld [vmem:[%s6342_s25 + $0x84] sm:$0xe]  ;;  %v5169_v23 = vld [vmem:[%s6342_s25 + $0x90] sm:$0xe] }
  0x89   : > { %v2825_v50 = vsel %vm6594_vm7, %v2823_v59, %v2824_v1  ;;  %v5183_v58 = vrot.slane %v5167_v47, 9  ;;  %v2835_v7 = vrot.slane %v6802_v40, 5  ;;  %v2838_v41 = vrot.slane %v6805_v55, 5  ;;  %v5112_v25 = vld [vmem:[%s6342_s25 + $0x98] sm:$0x1] }
  0x8a   : > { %v607_v4 = vsel %vm6368_vm4, %v602_v26, %v606_v31  ;;  %v5198_v12 = vcombine.low %v2822_v45, %v2825_v50  ;;  %v2832_v63 = vsel %vm6594_vm7, %v2830_v49, %v2831_v34  ;;  %v5184_v10 = vrot.slane %v5168_v61, 9  ;;  %v5114_v31 = vld [vmem:[%s6342_s25 + $0xa0] sm:$0xf]  ;;  %v5115_v60 = vld [vmem:[%s6342_s25 + $0xa4] sm:$0x1] }
  0x8b   : > { %v4914_v2 = vcombine.low %v597_v9, %v607_v4  ;;  %v5199_v6 = vcombine.low %v2829_v48, %v2832_v63  ;;  %v2842_v11 = vrot.slane %v5108_v57, 5  ;;  %v2845_v8 = vrot.slane %v5109_v54, 5  ;;  %v5170_v20 = vld [vmem:[%s6342_s25 + $0x9c] sm:$0xe]  ;;  %v6224_v44 = vld [vmem:[%s6342_s25 + $0xc] sm:$0xf] }
  0x8c   : > { %5776 = vmatmul.mubr.msk.bf16.gmra.mrb[12].mxu0 %vm658_vm3, %v5198_v12  ;;  %v2836_v18 = vsel %vm6594_vm7, %v5183_v58, %v2835_v7  ;;  %v2837_v21 = vrot.slane %v2835_v7, 4  ;;  %v2849_v28 = vrot.slane %v5111_v17, 5  ;;  %v6832_v34 = vld [vmem:[%s6342_s25 + $0x10] sm:$0xf]  ;;  %v6226_v47 = vld [vmem:[%s6342_s25 + $0x18] sm:$0xf] }
  0x8d   : > { %5622 = vmatmul.mubr.msk.bf16.gmra.mrb[28].mxu1 %vm658_vm3, %v4914_v2  ;;  %5779 = vmatprep.mubr.msk.bf16.mxu0 %vm658_vm3, %v5199_v6  ;;  %v2843_v38 = vsel %vm6594_vm7, %v5184_v10, %v2842_v11  ;;  %v2844_v1 = vrot.slane %v2842_v11, 4  ;;  %v4932_v45 = vcombine.low %v6224_v44, %v6832_v34  ;;  %v6839_v9 = vld [vmem:[%s6342_s25 + $0x1c] sm:$0xf]  ;;  %v5185_v48 = vrot.slane %v5169_v23, 9  ;;  %v5117_v57 = vld [vmem:[%s6342_s25 + $0xac] sm:$0xf] }
  0x8e   : > { %5627 = vmatprep.mubr.msk.bf16.mxu1 %vm658_vm3, %v4931_v62  ;;  %v2839_v59 = vsel %vm6594_vm7, %v2837_v21, %v2838_v41  ;;  %v4933_v26 = vcombine.low %v6226_v47, %v6839_v9  ;;  %v2851_v51 = vrot.slane %v2849_v28, 4  ;;  %v2852_v62 = vrot.slane %v5112_v25, 5  ;;  %v6228_v54 = vld [vmem:[%s8141_s1 + $0x4] sm:$0x3]  ;;  %v5120_v2 = vld [vmem:[%s6342_s25 + $0xb8] sm:$0xf] }
  0x8f   : > { %v5200_v49 = vcombine.low %v2836_v18, %v2839_v59  ;;  %v2846_v50 = vsel %vm6594_vm7, %v2844_v1, %v2845_v8  ;;  %v5186_v12 = vrot.slane %v5170_v20, 9  ;;  %v2856_v63 = vrot.slane %v5114_v31, 5  ;;  %v6854_v7 = vld [vmem:[%s8141_s1 + $0x6] sm:$0x3]  ;;  %v5118_v10 = vld [vmem:[%s6342_s25 + $0xb0] sm:$0x1] }
  0x90   : > { %v5201_v4 = vcombine.low %v2843_v38, %v2846_v50  ;;  %v2859_v58 = vrot.slane %v5115_v60, 5  ;;  %v1426_v61 = vsel %vm707_vm0, %v6228_v54, 0  ;;  %v2850_v41 = vsel %vm6594_vm7, %v5185_v48, %v2849_v28  ;;  %v5171_v11 = vld [vmem:[%s6342_s25 + $0xa8] sm:$0xe]  ;;  %v5121_v25 = vld [vmem:[%s6342_s25 + $0xbc] sm:$0x1] }
  0x91   : > { %v2858_v6 = vrot.slane %v2856_v63, 4  ;;  %v2853_v17 = vsel %vm6594_vm7, %v2851_v51, %v2852_v62  ;;  %v2863_v8 = vrot.slane %v5117_v57, 5  ;;  %v2857_v23 = vsel %vm6594_vm7, %v5186_v12, %v2856_v63  ;;  %v5172_v31 = vld [vmem:[%s6342_s25 + $0xb4] sm:$0xe]  ;;  %v6229_v38 = vld [vmem:[%s6342_s25 + $0x24] sm:$0xf] }
  0x92   : > { %v2870_v21 = vrot.slane %v5120_v2, 5  ;;  %v6875_v1 = vld [vmem:[%s6342_s25 + $0x28] sm:$0xf]  ;;  %v5202_v60 = vcombine.low %v2850_v41, %v2853_v17  ;;  %v5187_v44 = vrot.slane %v5171_v11, 9  ;;  %v2866_v59 = vrot.slane %v5118_v10, 5 }
  0x93   : > { %v2860_v18 = vsel %vm6594_vm7, %v2858_v6, %v2859_v58  ;;  %v4934_v28 = vcombine.low %v6229_v38, %v6875_v1  ;;  %v6231_v47 = vld [vmem:[%s6342_s25 + $0x30] sm:$0xf]  ;;  %v2873_v51 = vrot.slane %v5121_v25, 5  ;;  %v5123_v62 = vld [vmem:[%s6342_s25 + $0xc4] sm:$0xf]  ;;  %v2258_v25 = vshrl.u32 %v6802_v40, 16 }
  0x94   : > { %5780 = vmatmul.mubr.msk.bf16.gmra.mrb[16].mxu0 %vm658_vm3, %v5200_v49  ;;  %v5203_v20 = vcombine.low %v2857_v23, %v2860_v18  ;;  %v5188_v49 = vrot.slane %v5172_v31, 9  ;;  %v2872_v50 = vrot.slane %v2870_v21, 4  ;;  %v2864_v57 = vsel %vm6594_vm7, %v5187_v44, %v2863_v8  ;;  %v5173_v12 = vld [vmem:[%s6342_s25 + $0xc0] sm:$0xe]  ;;  %v6233_v41 = vld [vmem:[%s6342_s25 + $0x3c] sm:$0xf] }
  0x95   : > { %5628 = vmatmul.mubr.msk.bf16.vlgmr.msra.gmra.mrb[0].mxu1 %vm658_vm3, %v4932_v45  ;;  %5783 = vmatprep.mubr.msk.bf16.mxu0 %vm658_vm3, %v5201_v4  ;;  %v2865_v45 = vrot.slane %v2863_v8, 4  ;;  %v2877_v63 = vrot.slane %v5123_v62, 5  ;;  %v5189_v6 = vrot.slane %v5173_v12, 9  ;;  %v6900_v17 = vld [vmem:[%s6342_s25 + $0x40] sm:$0xf]  ;;  %v4937_v18 = vcombine.low %v6507_v27, %v6510_v36  ;;  %v6185_v62 = vld [vmem:[%s6342_s25 + $0x24] sm:$0xff]  }
  0x96   : > { %5660 = vmatpush3.bf16.msra.mxu1 %v1426_v61  ;;  %5631 = vmatprep.mubr.msk.bf16.mxu1 %vm658_vm3, %v4933_v26  ;;  %v6880_v26 = vld [vmem:[%s6342_s25 + $0x34] sm:$0xf]  ;;  %v2871_v58 = vsel %vm6594_vm7, %v5188_v49, %v2870_v21  ;;  %v2874_v54 = vsel %vm6594_vm7, %v2872_v50, %v2873_v51  ;;  %v5124_v61 = vld [vmem:[%s6342_s25 + $0xc8] sm:$0x1]  ;;  %v4936_v10 = vcombine.low %v6233_v41, %v6900_v17  ;;  %v2254_v21 = vshll.u32 %v6802_v40, 16 }
  0x97   : > { %6158 = vmatprep.subr.msk.bf16.mxu1 %vm707_vm0, %v6854_v7  ;;  %v4935_v48 = vcombine.low %v6231_v47, %v6880_v26  ;;  %v2867_v4 = vsel %vm6594_vm7, %v2865_v45, %v2866_v59  ;;  %v5205_v11 = vcombine.low %v2871_v58, %v2874_v54  ;;  %v2879_v8 = vrot.slane %v2877_v63, 4  ;;  %v1164_v45 = vld [vmem:[%s6342_s25] sm:$0xe]  ;;  %v1165_v59 = vld [vmem:[%s6342_s25 + $0xc] sm:$0xe] }
  0x98   : > { %v5204_v2 = vcombine.low %v2864_v57, %v2867_v4  ;;  %v2880_v23 = vrot.slane %v5124_v61, 5  ;;  %v2878_v31 = vsel %vm6594_vm7, %v5189_v6, %v2877_v63  ;;  %v6915_v27 = vrot.slane %v2254_v21, 5  ;;  %v1168_v41 = vld [vmem:[%s6342_s25 + $0x30] sm:$0xe] }
  0x99   : > { %v2260_v36 = vrot.slane %v2258_v25, 4  ;;  %v4939_v44 = vcombine.low %v6567_v19, %v6573_v35  ;;  %v2264_v47 = vshll.u32 %v6805_v55, 16  ;;  %v4963_v19 = vrot.slane %v1164_v45, 9 }
  0x9a   : > { %v2881_v38 = vsel %vm6594_vm7, %v2879_v8, %v2880_v23  ;;  %8162 = vst [vmem:[#allocation3_spill] sm:$0xff] %v6915_v27  ;;  %v4964_v35 = vrot.slane %v1165_v59, 9  ;;  %v1231_v4 = vrot.slane %v6839_v9, 5  ;;  %v1238_v12 = vrot.slane %v6875_v1, 5  ;;  %v1169_v8 = vld [vmem:[%s6342_s25 + $0x3c] sm:$0xe] }
  0x9b   : > { %v5206_v40 = vcombine.low %v2878_v31, %v2881_v38  ;;  %v2261_v49 = vor.u32 %v2260_v36, %v6915_v27  ;;  %v6935_v51 = vrot.slane %v2264_v47, 5  ;;  %v4940_v58 = vcombine.low %v6588_v0, %v6601_v29  ;;  %v1170_v31 = vld [vmem:[%s6342_s25 + $0x48] sm:$0xe]  ;;  %v6239_v59 = vld [vmem:[%s6342_s25 + $0x38] sm:$0x1] }
  0x9c   : > { %5784 = vmatmul.mubr.msk.bf16.gmra.mrb[20].mxu0 %vm658_vm3, %v5202_v60  ;;  %v4938_v60 = vcombine.low %v6536_v24, %v6542_v37  ;;  %v6236_v24 = vld [vmem:[%s6342_s25 + $0x14] sm:$0x1]  ;;  %v4066_v54 = vsel %vm707_vm0, %v6659_v22, 0  ;;  %v4941_v61 = vcombine.low %v6620_v53, %v6627_v16  ;;  %v4942_v6 = vcombine.low %v6646_v39, %v6654_v43  ;;  %v6237_v16 = vld [vmem:[%s6342_s25 + $0x20] sm:$0x1] }
  0x9d   : > { %5632 = vmatmul.mubr.msk.bf16.gmra.mrb[4].mxu1 %vm658_vm3, %v4934_v28  ;;  %5787 = vmatprep.mubr.msk.bf16.mxu0 %vm658_vm3, %v5203_v20  ;;  %v1224_v28 = vrot.slane %v6832_v34, 5  ;;  %v6183_v20 = vld [vmem:[%s6342_s25 + $0x18] sm:$0xff]   ;;  %v6235_v34 = vld [vmem:[%s6342_s25 + $0x8] sm:$0x1]  ;;  %v1227_v37 = vrot.slane %v6236_v24, 5  ;;  %8163 = vst [vmem:[#allocation4_spill] sm:$0xff] %v6935_v51  ;;  %v4943_v9 = vcombine.low %v6678_v5, %v6690_v30 }
  0x9e   : > { %5635 = vmatprep.mubr.msk.bf16.mxu1 %vm658_vm3, %v4935_v48  ;;  %v1217_v48 = vrot.slane %v6798_v15, 5  ;;  %v1220_v50 = vrot.slane %v6235_v34, 5  ;;  %v1166_v15 = vld [vmem:[%s6342_s25 + $0x18] sm:$0xe]  ;;  %v6940_v63 = vrot.slane %v2261_v49, 4  ;;  %v1234_v22 = vrot.slane %v6237_v16, 5 }
  0x9f   : > { %v1226_v55 = vrot.slane %v1224_v28, 4  ;;  %v4965_v1 = vrot.slane %v1166_v15, 9  ;;  %v6962_v29 = vsel %vm6594_vm7, %v4964_v35, %v1224_v28  ;;  %v1240_v25 = vrot.slane %v1238_v12, 4  ;;  %v5288_v24 = vld [vmem:[%s6342_s25 + $0x18] sm:$0xf] }
  0xa0   : > { %v1219_v57 = vrot.slane %v1217_v48, 4  ;;  %8164 = vst [vmem:[#allocation5_spill] sm:$0xff] %v6940_v63  ;;  %v6958_v0 = vsel %vm6594_vm7, %v4963_v19, %v1217_v48  ;;  %v1248_v47 = vrot.slane %v6239_v59, 5  ;;  %v6999_v49 = vsel %vm707_vm0, %v6854_v7, 0  ;;  %v5289_v7 = vld [vmem:[%s6342_s25 + $0x1c] sm:$0xf] }
  0xa1   : > { %v6966_v53 = vsel %vm6594_vm7, %v1226_v55, %v1227_v37  ;;  %v7003_v34 = vsel %vm6594_vm7, %v4965_v1, %v1231_v4  ;;  %v6189_v37 = vld [vmem:[%s6342_s25 + $0x3c] sm:$0xff]   ;;  %v4968_v35 = vrot.slane %v1169_v8, 9  ;;  %v6240_v55 = vld [vmem:[%s6342_s25 + $0x44] sm:$0x1]  ;;  %v3587_v8 = vshll.u32 %v5288_v24, 16 }
  0xa2   : > { %v6977_v23 = vsel %vm6594_vm7, %v1219_v57, %v1220_v50  ;;  %v1171_v50 = vld [vmem:[%s6342_s25 + $0x54] sm:$0xe]  ;;  %v1255_v15 = vrot.slane %v6240_v55, 5  ;;  %v5292_v39 = vld [vmem:[%s6342_s25 + $0x28] sm:$0xf] }
  0xa3   : > { %v6247_v5 = vld [vmem:[%s6342_s25 + $0x70] sm:$0xf] }
  0xa4   : > { %5788 = vmatmul.mubr.msk.bf16.gmra.mrb[24].mxu0 %vm658_vm3, %v5204_v2  ;;  %v1167_v2 = vld [vmem:[%s6342_s25 + $0x24] sm:$0xe]  ;;  %v1280_v30 = vrot.slane %v6247_v5, 5 }
  0xa5   : > { %5636 = vmatmul.mubr.msk.bf16.gmra.mrb[8].mxu1 %vm658_vm3, %v4936_v10  ;;  %5791 = vmatprep.mubr.msk.bf16.mxu0 %vm658_vm3, %v5205_v11  ;;  %v1245_v10 = vrot.slane %v6880_v26, 5  ;;  %v6187_v11 = vld [vmem:[%s6342_s25 + $0x30] sm:$0xff]   ;;  %v4966_v21 = vrot.slane %v1167_v2, 9 }
  0xa6   : > { %5639 = vmatprep.mubr.msk.bf16.mxu1 %vm658_vm3, %v4937_v18  ;;  %v6973_v26 = vld [vmem:[%s8141_s1 + $0x10] sm:$0x3]  ;;  %v1233_v18 = vrot.slane %v1231_v4, 4  ;;  %v1282_v48 = vrot.slane %v1280_v30, 4 }
  0xa7   : > { %v1247_v45 = vrot.slane %v1245_v10, 4  ;;  %v7010_v19 = vsel %vm6594_vm7, %v4966_v21, %v1238_v12  ;;  %v3597_v21 = vshrl.u32 %v5289_v7, 16 }
  0xa8   : > { %v7019_v4 = vsel %vm6594_vm7, %v1233_v18, %v1234_v22  ;;  %v3584_v22 = vshrl.u32 %v5288_v24, 16  ;;  %v3593_v18 = vshll.u32 %v5289_v7, 16  ;;  %v5291_v24 = vld [vmem:[%s6342_s25 + $0x24] sm:$0xf] }
  0xa9   : > { %v7032_v1 = vsel %vm6594_vm7, %v1247_v45, %v1248_v47 }
  0xaa   : > { %v3586_v43 = vrot.slane %v3584_v22, 4  ;;  %v7074_v7 = vrot.slane %v3593_v18, 5  ;;  %v3611_v22 = vshll.u32 %v5291_v24, 16  ;;  %v3621_v18 = vshrl.u32 %v5292_v39, 16 }
  0xac   : > { %5792 = vmatmul.mubr.msk.bf16.gmra.mrb[28].mxu0 %vm658_vm3, %v5206_v40  ;;  %v6238_v40 = vld [vmem:[%s6342_s25 + $0x2c] sm:$0x1]  ;;  %v3613_v27 = vrot.slane %v3611_v22, 5 }
  0xad   : > { %5640 = vmatmul.mubr.msk.bf16.gmra.mrb[12].mxu1 %vm658_vm3, %v4938_v60  ;;  %5797 = vmatprep.mubr.msk.bf16.mxu0 %vm658_vm3, %v6183_v20  ;;  %v1241_v28 = vrot.slane %v6238_v40, 5  ;;  %v1252_v60 = vrot.slane %v6900_v17, 5  ;;  %v6243_v40 = vld [vmem:[%s6342_s25 + $0x50] sm:$0x1]  ;;  %v6248_v17 = vld [vmem:[%s6342_s25 + $0x74] sm:$0x1] }
  0xae   : > { %5643 = vmatprep.mubr.msk.bf16.mxu1 %vm658_vm3, %v4939_v44  ;;  %v4967_v44 = vrot.slane %v1168_v41, 9  ;;  %v4970_v41 = vrot.slane %v1171_v50, 9  ;;  %v1172_v50 = vld [vmem:[%s6342_s25 + $0x60] sm:$0xe]  ;;  %v5293_v20 = vld [vmem:[%s6342_s25 + $0x2c] sm:$0x1] }
  0xaf   : > { %v1254_v12 = vrot.slane %v1252_v60, 4  ;;  %v7045_v45 = vsel %vm6594_vm7, %v4968_v35, %v1252_v60  ;;  %v6244_v35 = vld [vmem:[%s6342_s25 + $0x5c] sm:$0x1] }
  0xb0   : > { %v7028_v2 = vsel %vm6594_vm7, %v4967_v44, %v1245_v10  ;;  %v1269_v55 = vrot.slane %v6244_v35, 5  ;;  %v1173_v35 = vld [vmem:[%s6342_s25 + $0x6c] sm:$0xe] }
  0xb1   : > { %v7049_v59 = vsel %vm6594_vm7, %v1254_v12, %v1255_v15  ;;  %v6245_v15 = vld [vmem:[%s6342_s25 + $0x64] sm:$0xf]  ;;  %v3599_v12 = vrot.slane %v3597_v21, 4  ;;  %v4972_v5 = vrot.slane %v1173_v35, 9 }
  0xb2   : > { %v6195_v21 = vld [vmem:[%s6342_s25 + $0x60] sm:$0xff]  }
  0xb4   : > { %5798 = vmatmul.mubr.msk.bf16.vlgmr.msra.gmra.mrb[0].mxu0 %vm658_vm3, %v6185_v62  ;;  %v6241_v62 = vld [vmem:[%s6342_s25 + $0x4c] sm:$0xf] }
  0xb5   : > { %5644 = vmatmul.mubr.msk.bf16.gmra.mrb[16].mxu1 %vm658_vm3, %v4940_v58  ;;  %5830 = vmatpush3.bf16.msra.mxu0 %v4066_v54  ;;  %v1259_v57 = vrot.slane %v6241_v62, 5  ;;  %v7023_v58 = vsel %vm6594_vm7, %v1240_v25, %v1241_v28  ;;  %v4969_v54 = vrot.slane %v1170_v31, 9  ;;  %v1262_v28 = vrot.slane %v6243_v40, 5 }
  0xb6   : > { %5647 = vmatprep.mubr.msk.bf16.mxu1 %vm658_vm3, %v4941_v61  ;;  %5801 = vmatprep.mubr.msk.bf16.mxu0 %vm658_vm3, %v6187_v11  ;;  %v6191_v61 = vld [vmem:[%s6342_s25 + $0x48] sm:$0xff]   ;;  %v6242_v11 = vld [vmem:[%s6342_s25 + $0x58] sm:$0xf]  ;;  %v1273_v62 = vrot.slane %v6245_v15, 5  ;;  %v5295_v15 = vld [vmem:[%s6342_s25 + $0x34] sm:$0xf] }
  0xb7   : > { %6164 = vmatprep.subr.msk.bf16.mxu0 %vm707_vm0, %v6973_v26  ;;  %v1266_v16 = vrot.slane %v6242_v11, 5  ;;  %v1261_v31 = vrot.slane %v1259_v57, 4  ;;  %v7053_v47 = vsel %vm6594_vm7, %v4969_v54, %v1259_v57  ;;  %v5290_v57 = vld [vmem:[%s6342_s25 + $0x20] sm:$0x1]  ;;  %v5294_v54 = vld [vmem:[%s6342_s25 + $0x30] sm:$0xf] }
  0xb8   : > { %v4971_v11 = vrot.slane %v1172_v50, 9  ;;  %v3635_v50 = vshll.u32 %v5294_v54, 16  ;;  %v3603_v25 = vshll.u32 %v5290_v57, 16  ;;  %v3641_v36 = vshll.u32 %v5295_v15, 16 }
  0xb9   : > { %v7064_v60 = vsel %vm6594_vm7, %v4970_v41, %v1266_v16  ;;  %v7080_v41 = vsel %vm6594_vm7, %v1261_v31, %v1262_v28  ;;  %v1275_v31 = vrot.slane %v1273_v62, 4  ;;  %v3632_v28 = vshrl.u32 %v5294_v54, 16 }
  0xba   : > { %v7122_v35 = vrot.slane %v3641_v36, 5 }
  0xbc   : > { %5802 = vmatmul.mubr.msk.bf16.gmra.mrb[4].mxu0 %vm658_vm3, %v6189_v37  ;;  %v1268_v37 = vrot.slane %v1266_v16, 4  ;;  %v6246_v16 = vld [vmem:[%s6342_s25 + $0x68] sm:$0x1] }
  0xbd   : > { %5648 = vmatmul.mubr.msk.bf16.gmra.mrb[20].mxu1 %vm658_vm3, %v4942_v6  ;;  %5805 = vmatprep.mubr.msk.bf16.mxu0 %vm658_vm3, %v6191_v61  ;;  %v3589_v6 = vrot.slane %v3587_v8, 5  ;;  %v6193_v61 = vld [vmem:[%s6342_s25 + $0x54] sm:$0xff]   ;;  %v1276_v40 = vrot.slane %v6246_v16, 5  ;;  %v3617_v8 = vshll.u32 %v5292_v39, 16  ;;  %v3600_v16 = vor.u32 %v3599_v12, %v7074_v7 }
  0xbe   : > { %5651 = vmatprep.mubr.msk.bf16.mxu1 %vm658_vm3, %v4943_v9  ;;  %v3608_v9 = vshrl.u32 %v5291_v24, 16  ;;  %v7089_v44 = vsel %vm6594_vm7, %v1268_v37, %v1269_v55  ;;  %v1283_v24 = vrot.slane %v6248_v17, 5  ;;  %v3645_v39 = vshrl.u32 %v5295_v15, 16 }
  0xbf   : > { %v3590_v10 = vor.u32 %v3589_v6, %v3586_v43  ;;  %v7095_v37 = vrot.slane %v3617_v8, 5  ;;  %v3623_v55 = vrot.slane %v3621_v18, 4  ;;  %v8165_v43 = vcombine.low %v6699_v52, %v6710_v46  ;;  %v6249_v8 = vld [vmem:[%s6342_s25 + $0x7c] sm:$0xf]  ;;  %v7131_v18 = vld [vmem:[%s6342_s25 + $0x38] sm:$0x1] }
  0xc0   : > { %v3610_v38 = vrot.slane %v3608_v9, 4  ;;  %v7104_v17 = vsel %vm6594_vm7, %v4971_v11, %v1273_v62  ;;  %v7108_v57 = vsel %vm6594_vm7, %v1275_v31, %v1276_v40  ;;  %v3634_v6 = vrot.slane %v3632_v28, 4  ;;  %8167 = vst [vmem:[#allocation6_spill] sm:$0xff] %v7131_v18 }
  0xc1   : > { %v3637_v12 = vrot.slane %v3635_v50, 5  ;;  %v8166_v52 = vcombine.low %v6731_v33, %v6736_v56  ;;  %v3591_v46 = vrot.slane %v3590_v10, 4  ;;  %v3601_v54 = vrot.slane %v3600_v16, 4  ;;  %v6197_v33 = vld [vmem:[%s6342_s25 + $0x6c] sm:$0xff]   ;;  %v1175_v16 = vld [vmem:[%s6342_s25 + $0x84] sm:$0xe] }
  0xc2   : > { %v3627_v62 = vshll.u32 %v5293_v20, 16  ;;  %v7116_v11 = vsel %vm6594_vm7, %v4972_v5, %v1280_v30  ;;  %v7120_v40 = vsel %vm6594_vm7, %v1282_v48, %v1283_v24  ;;  %v3647_v9 = vrot.slane %v3645_v39, 4  ;;  %v6198_v48 = vld [vmem:[%s6342_s25 + $0x78] sm:$0xff]  }
  0xc3   : > { %v3614_v10 = vor.u32 %v3613_v27, %v3610_v38  ;;  %v3624_v20 = vor.u32 %v3623_v55, %v7095_v37  ;;  %v1287_v30 = vrot.slane %v6249_v8, 5  ;;  %v3638_v38 = vor.u32 %v3637_v12, %v3634_v6  ;;  %v5297_v5 = vld [vmem:[%s6342_s25 + $0x3c] sm:$0xf] }
  0xc4   : > { %5806 = vmatmul.mubr.msk.bf16.gmra.mrb[8].mxu0 %vm658_vm3, %v6193_v61  ;;  %v3605_v61 = vrot.slane %v3603_v25, 5  ;;  %v1174_v25 = vld [vmem:[%s6342_s25 + $0x78] sm:$0xe]  ;;  %v7147_v50 = vrot.slane %v3627_v62, 5  ;;  %v3648_v39 = vor.u32 %v3647_v9, %v7122_v35  ;;  %v3651_v55 = vshll.u32 %v7131_v18, 16 }
  0xc5   : > { %5652 = vmatmul.mubr.msk.bf16.gmra.mrb[24].mxu1 %vm658_vm3, %v8165_v43  ;;  %5809 = vmatprep.mubr.msk.bf16.mxu0 %vm658_vm3, %v6195_v21  ;;  %v3596_v21 = vsel %vm6368_vm4, %v3591_v46, %v7074_v7  ;;  %v4973_v24 = vrot.slane %v1174_v25, 9  ;;  %v6250_v43 = vld [vmem:[%s6342_s25 + $0x88] sm:$0xf]  ;;  %v7155_v7 = vld [vmem:[%s6342_s25 + $0x40] sm:$0xf]  ;;  %v3615_v12 = vrot.slane %v3614_v10, 4  ;;  %v8169_v62 = vcombine.low %v6751_v14, %v6760_v42 }
  0xc6   : > { %5655 = vmatprep.mubr.msk.bf16.mxu1 %vm658_vm3, %v8166_v52  ;;  %v3606_v31 = vsel %vm6368_vm4, %v3601_v54, %v3605_v61  ;;  %v1294_v6 = vrot.slane %v6250_v43, 5  ;;  %8168 = vst [vmem:[#allocation7_spill] sm:$0xff] %v7155_v7  ;;  %v3625_v52 = vrot.slane %v3624_v20, 4  ;;  %v1289_v46 = vrot.slane %v1287_v30, 4  ;;  %v6251_v54 = vld [vmem:[%s6342_s25 + $0x80] sm:$0x1] }
  0xc7   : > { %v1290_v61 = vrot.slane %v6251_v54, 5  ;;  %v3639_v9 = vrot.slane %v3638_v38, 4  ;;  %v4974_v25 = vrot.slane %v1175_v16, 9  ;;  %v3656_v8 = vshrl.u32 %v5297_v5, 16  ;;  %v6199_v10 = vld [vmem:[%s6342_s25 + $0x84] sm:$0xff]  }
  0xc8   : > { %v3659_v43 = vshll.u32 %v5297_v5, 16  ;;  %v7169_v20 = vcombine.low %v3596_v21, %v3606_v31  ;;  %v7173_v14 = vsel %vm707_vm0, %v6973_v26, 0  ;;  %v3669_v38 = vshrl.u32 %v7155_v7, 16  ;;  %v6200_v21 = vld [vmem:[%s6342_s25 + $0x90] sm:$0xff]   ;;  %v6256_v18 = vld [vmem:[%s6342_s25 + $0xa0] sm:$0xf] }
  0xc9   : > { %v3649_v16 = vrot.slane %v3648_v39, 4  ;;  %v3653_v5 = vrot.slane %v3651_v55, 5  ;;  %v1296_v54 = vrot.slane %v1294_v6, 4  ;;  %v3620_v31 = vsel %vm6368_vm4, %v3615_v12, %v7095_v37 }
  0xca   : > { %v3630_v26 = vsel %vm6368_vm4, %v3625_v52, %v7147_v50  ;;  %v7188_v39 = vsel %vm6594_vm7, %v4973_v24, %v1287_v30  ;;  %v7192_v55 = vsel %vm6594_vm7, %v1289_v46, %v1290_v61  ;;  %v3644_v37 = vsel %vm6368_vm4, %v3639_v9, %v7122_v35  ;;  %v5303_v30 = vld [vmem:[%s6342_s25 + $0x54] sm:$0xf]  ;;  %v7209_v24 = vld [vmem:[%s6342_s25 + $0x58] sm:$0xf]  ;;  %v7214_v61 = vld [vmem:[%s6342_s25 + $0x90] sm:$0xe] }
  0xcb   : > { %v7205_v12 = vsel %vm6594_vm7, %v4974_v25, %v1294_v6  ;;  %v3658_v50 = vrot.slane %v3656_v8, 4  ;;  %v3661_v52 = vrot.slane %v3659_v43, 5  ;;  %v3671_v46 = vrot.slane %v3669_v38, 4 }
  0xcc   : > { %5810 = vmatmul.mubr.msk.bf16.gmra.mrb[12].mxu0 %vm658_vm3, %v6197_v33  ;;  %v8170_v33 = vcombine.low %v6958_v0, %v6977_v23  ;;  %v6252_v0 = vld [vmem:[%s6342_s25 + $0x8c] sm:$0x1]  ;;  %v3654_v36 = vsel %vm6368_vm4, %v3649_v16, %v3653_v5  ;;  %v3704_v25 = vshrl.u32 %v5303_v30, 16  ;;  %v3707_v8 = vshll.u32 %v5303_v30, 16 }
  0xcd   : > { %5656 = vmatmul.mubr.msk.bf16.gmra.mrb[28].mxu1 %vm658_vm3, %v8169_v62  ;;  %5813 = vmatprep.mubr.msk.bf16.mxu0 %vm658_vm3, %v6198_v48  ;;  %v3665_v48 = vshll.u32 %v7155_v7, 16  ;;  %v1297_v23 = vrot.slane %v6252_v0, 5  ;;  %v5300_v62 = vld [vmem:[%s6342_s25 + $0x48] sm:$0xf]  ;;  %v7198_v0 = vld [vmem:[%s6342_s25 + $0x4c] sm:$0xf]  ;;  %v8172_v38 = vcombine.low %v6962_v29, %v6966_v53  ;;  %v7232_v16 = vcombine.low %v3620_v31, %v3630_v26 }
  0xce   : > { %5661 = vmatprep.mubr.msk.bf16.mxu1 %vm658_vm3, %v8170_v33  ;;  %v7195_v33 = vld [vmem:[%s6342_s25 + $0x44] sm:$0x1]  ;;  %v3680_v27 = vshrl.u32 %v5300_v62, 16  ;;  %v3683_v15 = vshll.u32 %v5300_v62, 16  ;;  %v3689_v6 = vshll.u32 %v7198_v0, 16  ;;  %v3693_v9 = vshrl.u32 %v7198_v0, 16 }
  0xcf   : > { %8171 = vst [vmem:[#allocation8_spill] sm:$0xff] %v7195_v33  ;;  %v7211_v28 = vrot.slane %v3665_v48, 5  ;;  %v7220_v35 = vsel %vm6594_vm7, %v1296_v54, %v1297_v23  ;;  %v3713_v43 = vshll.u32 %v7209_v24, 16  ;;  %v3717_v48 = vshrl.u32 %v7209_v24, 16  ;;  %v5306_v31 = vld [vmem:[%s6342_s25 + $0x60] sm:$0xf] }
  0xd0   : > { %v3675_v5 = vshll.u32 %v7195_v33, 16  ;;  %v4975_v54 = vrot.slane %v7214_v61, 9  ;;  %v8173_v23 = vcombine.low %v7003_v34, %v7019_v4  ;;  %v7243_v29 = vcombine.low %v3644_v37, %v3654_v36  ;;  %v6201_v26 = vld [vmem:[%s6342_s25 + $0x9c] sm:$0xff]   ;;  %v6202_v30 = vld [vmem:[%s6342_s25 + $0xa8] sm:$0xff]  }
  0xd1   : > { %v3662_v53 = vor.u32 %v3661_v52, %v3658_v50  ;;  %v3682_v62 = vrot.slane %v3680_v27, 4  ;;  %v7254_v34 = vrot.slane %v3689_v6, 5  ;;  %v3695_v4 = vrot.slane %v3693_v9, 4  ;;  %v6253_v36 = vld [vmem:[%s8141_s1 + $0x8] sm:$0x3] }
  0xd2   : > { %v3706_v27 = vrot.slane %v3704_v25, 4  ;;  %v3709_v37 = vrot.slane %v3707_v8, 5  ;;  %v7263_v50 = vrot.slane %v3713_v43, 5  ;;  %v3719_v52 = vrot.slane %v3717_v48, 4  ;;  %v6254_v6 = vld [vmem:[%s6342_s25 + $0x94] sm:$0xf] }
  0xd3   : > { %v7269_v9 = vld [vmem:[%s6342_s25 + $0x64] sm:$0xf]  ;;  %v3728_v61 = vshrl.u32 %v5306_v31, 16  ;;  %v7271_v22 = vrot.slane %v3662_v53, 4  ;;  %v1308_v25 = vrot.slane %v6256_v18, 5  ;;  %v3696_v43 = vor.u32 %v3695_v4, %v7254_v34 }
  0xd4   : > { %5814 = vmatmul.mubr.msk.bf16.gmra.mrb[16].mxu0 %vm658_vm3, %v6199_v10  ;;  %8174 = vst [vmem:[#allocation9_spill] sm:$0xff] %v7269_v9  ;;  %v3731_v10 = vshll.u32 %v5306_v31, 16  ;;  %v3710_v31 = vor.u32 %v3709_v37, %v3706_v27  ;;  %v3720_v53 = vor.u32 %v3719_v52, %v7263_v50  ;;  %v8175_v18 = vcombine.low %v7010_v19, %v7023_v58  ;;  %v6203_v37 = vld [vmem:[%s6342_s25 + $0xb4] sm:$0xff]  }
  0xd5   : > { %5662 = vmatmul.mubr.msk.bf16.vlgmr.msra.gmra.mrb[0].mxu1 %vm658_vm3, %v8172_v38  ;;  %5817 = vmatprep.mubr.msk.bf16.mxu0 %vm658_vm3, %v6200_v21  ;;  %v3685_v21 = vrot.slane %v3683_v15, 5  ;;  %v7252_v38 = vld [vmem:[%s6342_s25 + $0x50] sm:$0x1]  ;;  %v7261_v15 = vld [vmem:[%s6342_s25 + $0x5c] sm:$0x1]  ;;  %v8176_v27 = vcombine.low %v7028_v2, %v7032_v1  ;;  %v1310_v52 = vrot.slane %v1308_v25, 4 }
  0xd6   : > { %5694 = vmatpush3.bf16.msra.mxu1 %v6999_v49  ;;  %5665 = vmatprep.mubr.msk.bf16.mxu1 %vm658_vm3, %v8173_v23  ;;  %v3672_v49 = vor.u32 %v3671_v46, %v7211_v28  ;;  %v7265_v46 = vrot.slane %v3675_v5, 5  ;;  %v1301_v23 = vrot.slane %v6254_v6, 5  ;;  %v3699_v48 = vshll.u32 %v7252_v38, 16  ;;  %v1177_v5 = vld [vmem:[%s6342_s25 + $0x9c] sm:$0xe] }
  0xd7   : > { %6160 = vmatprep.subr.msk.bf16.mxu1 %vm707_vm0, %v6253_v36  ;;  %v6255_v36 = vld [vmem:[%s6342_s25 + $0x98] sm:$0x1]  ;;  %v3686_v7 = vor.u32 %v3685_v21, %v3682_v62  ;;  %v3723_v6 = vshll.u32 %v7261_v15, 16  ;;  %v3741_v62 = vshrl.u32 %v7269_v9, 16  ;;  %v3733_v4 = vrot.slane %v3731_v10, 5 }
  0xd8   : > { %v1304_v33 = vrot.slane %v6255_v36, 5  ;;  %v3673_v8 = vrot.slane %v3672_v49, 4  ;;  %v3737_v36 = vshll.u32 %v7269_v9, 16  ;;  %v7290_v21 = vsel %vm6594_vm7, %v4975_v54, %v1301_v23  ;;  %v7301_v2 = vld [vmem:[%s6342_s25 + $0x68] sm:$0x1] }
  0xd9   : > { %v3730_v49 = vrot.slane %v3728_v61, 4  ;;  %v3687_v19 = vrot.slane %v3686_v7, 4  ;;  %v4976_v58 = vrot.slane %v1177_v5, 9  ;;  %v3697_v3 = vrot.slane %v3696_v43, 4  ;;  %8177 = vst [vmem:[#allocation10_spill] sm:$0xff] %v7301_v2  ;;  %v6204_v5 = vld [vmem:[%s6342_s25 + $0xc0] sm:$0xff]  }
  0xda   : > { %v3701_v54 = vrot.slane %v3699_v48, 5  ;;  %v3725_v63 = vrot.slane %v3723_v6, 5  ;;  %v1315_v61 = vrot.slane %v6736_v56, 5  ;;  %v3711_v10 = vrot.slane %v3710_v31, 4  ;;  %v1179_v31 = vld [vmem:[%s6342_s25 + $0xb4] sm:$0xe] }
  0xdb   : > { %v3721_v51 = vrot.slane %v3720_v53, 4  ;;  %v7303_v1 = vrot.slane %v3737_v36, 5  ;;  %v3743_v7 = vrot.slane %v3741_v62, 4  ;;  %v3668_v43 = vsel %vm6368_vm4, %v7271_v22, %v7211_v28  ;;  %v6258_v62 = vld [vmem:[%s6342_s25 + $0xb0] sm:$0x1] }
  0xdc   : > { %5818 = vmatmul.mubr.msk.bf16.gmra.mrb[20].mxu0 %vm658_vm3, %v6201_v26  ;;  %v1303_v26 = vrot.slane %v1301_v23, 4  ;;  %v1178_v23 = vld [vmem:[%s6342_s25 + $0xa8] sm:$0xe]  ;;  %v3678_v48 = vsel %vm6368_vm4, %v3673_v8, %v7265_v46  ;;  %v3734_v6 = vor.u32 %v3733_v4, %v3730_v49  ;;  %v3692_v53 = vsel %vm6368_vm4, %v3687_v19, %v7254_v34  ;;  %v5309_v46 = vld [vmem:[%s6342_s25 + $0x6c] sm:$0xf] }
  0xdd   : > { %5666 = vmatmul.mubr.msk.bf16.gmra.mrb[4].mxu1 %vm658_vm3, %v8175_v18  ;;  %5821 = vmatprep.mubr.msk.bf16.mxu0 %vm658_vm3, %v6202_v30  ;;  %v6257_v18 = vld [vmem:[%s6342_s25 + $0xa4] sm:$0x1]  ;;  %v7323_v36 = vsel %vm6594_vm7, %v4976_v58, %v1308_v25  ;;  %v4977_v28 = vrot.slane %v1178_v23, 9  ;;  %v1317_v8 = vrot.slane %v1315_v61, 4  ;;  %v3747_v49 = vshll.u32 %v7301_v2, 16 }
  0xde   : > { %5669 = vmatprep.mubr.msk.bf16.mxu1 %vm658_vm3, %v8176_v27  ;;  %v1311_v30 = vrot.slane %v6257_v18, 5  ;;  %v7315_v56 = vsel %vm6594_vm7, %v1303_v26, %v1304_v33  ;;  %v3702_v33 = vsel %vm6368_vm4, %v3697_v3, %v3701_v54  ;;  %v1318_v26 = vrot.slane %v6258_v62, 5  ;;  %v5312_v18 = vld [vmem:[%s6342_s25 + $0x78] sm:$0xf]  ;;  %v7378_v54 = vld [vmem:[%s6342_s25 + $0xbc] sm:$0x1] }
  0xdf   : > { %v3716_v34 = vsel %vm6368_vm4, %v3711_v10, %v7263_v50  ;;  %v3726_v25 = vsel %vm6368_vm4, %v3721_v51, %v3725_v63  ;;  %v3744_v4 = vor.u32 %v3743_v7, %v7303_v1  ;;  %v4978_v27 = vrot.slane %v1179_v31, 9  ;;  %v7352_v51 = vld [vmem:[%s6342_s25 + $0x70] sm:$0xf]  ;;  %v7382_v10 = vld [vmem:[%s6342_s25 + $0x7c] sm:$0xf] }
  0xe0   : > { %v7327_v22 = vsel %vm6594_vm7, %v1310_v52, %v1311_v30  ;;  %v8179_v3 = vcombine.low %v7045_v45, %v7049_v59  ;;  %v7348_v19 = vrot.slane %v3734_v6, 4  ;;  %v1322_v50 = vrot.slane %v6760_v42, 5  ;;  %8180 = vst [vmem:[#allocation12_spill] sm:$0xff] %v7352_v51  ;;  %8182 = vst [vmem:[#allocation13_spill] sm:$0xff] %v7382_v10  ;;  %v5315_v7 = vld [vmem:[%s6342_s25 + $0x84] sm:$0xf] }
  0xe1   : > { %8178 = vst [vmem:[#allocation11_spill] sm:$0xff] %v7327_v22  ;;  %v3752_v63 = vshrl.u32 %v5309_v46, 16  ;;  %v8181_v45 = vcombine.low %v7053_v47, %v7080_v41  ;;  %v7360_v58 = vcombine.low %v3692_v53, %v3702_v33  ;;  %v7366_v42 = vsel %vm6594_vm7, %v4977_v28, %v1315_v61  ;;  %v6205_v61 = vld [vmem:[%s6342_s25 + $0xcc] sm:$0xff]   ;;  %v7394_v31 = vld [vmem:[%s6342_s25 + $0x88] sm:$0xf] }
  0xe2   : > { %v7369_v30 = vcombine.low %v3716_v34, %v3726_v25  ;;  %v7373_v47 = vsel %vm6594_vm7, %v1317_v8, %v1318_v26  ;;  %v7375_v41 = vrot.slane %v3747_v49, 5  ;;  %v3761_v6 = vshll.u32 %v7352_v51, 16  ;;  %8183 = vst [vmem:[#allocation14_spill] sm:$0xff] %v7394_v31  ;;  %v5318_v62 = vld [vmem:[%s6342_s25 + $0x90] sm:$0xf] }
  0xe3   : > { %v7400_v28 = vrot.slane %v1322_v50, 4  ;;  %v7402_v33 = vrot.slane %v3752_v63, 4  ;;  %v3765_v8 = vshrl.u32 %v7352_v51, 16  ;;  %v3776_v26 = vshrl.u32 %v5312_v18, 16  ;;  %v7409_v25 = vld [vmem:[%s6342_s25 + $0x94] sm:$0xf] }
  0xe4   : > { %5822 = vmatmul.mubr.msk.bf16.gmra.mrb[24].mxu0 %vm658_vm3, %v6203_v37  ;;  %v7346_v37 = vcombine.low %v3668_v43, %v3678_v48  ;;  %v7390_v43 = vsel %vm6594_vm7, %v4978_v27, %v1322_v50  ;;  %v3755_v48 = vshll.u32 %v5309_v46, 16  ;;  %v3779_v49 = vshll.u32 %v5312_v18, 16  ;;  %8184 = vst [vmem:[#allocation15_spill] sm:$0xff] %v7409_v25  ;;  %v7447_v2 = vld [vmem:[%s6342_s25 + $0x8c] sm:$0x1] }
  0xe5   : > { %5670 = vmatmul.mubr.msk.bf16.gmra.mrb[8].mxu1 %vm658_vm3, %v8179_v3  ;;  %5825 = vmatprep.mubr.msk.bf16.mxu0 %vm658_vm3, %v6204_v5  ;;  %v7386_v5 = vrot.slane %v3744_v4, 4  ;;  %v3785_v46 = vshll.u32 %v7382_v10, 16  ;;  %v3789_v34 = vshrl.u32 %v7382_v10, 16  ;;  %v3800_v4 = vshrl.u32 %v5315_v7, 16 }
  0xe6   : > { %5673 = vmatprep.mubr.msk.bf16.mxu1 %vm658_vm3, %v8181_v45  ;;  %v3803_v27 = vshll.u32 %v5315_v7, 16  ;;  %v3809_v3 = vshll.u32 %v7394_v31, 16  ;;  %v3813_v50 = vshrl.u32 %v7394_v31, 16  ;;  %v7419_v45 = vld [vmem:[%s6342_s25 + $0x74] sm:$0x1]  ;;  %v3757_v18 = vrot.slane %v3755_v48, 5 }
  0xe7   : > { %v3824_v52 = vshrl.u32 %v5318_v62, 16  ;;  %v3827_v53 = vshll.u32 %v5318_v62, 16  ;;  %v8185_v7 = vcombine.low %v7064_v60, %v7089_v44  ;;  %v3767_v59 = vrot.slane %v3765_v8, 4  ;;  %v5321_v48 = vld [vmem:[%s6342_s25 + $0x9c] sm:$0xf] }
  0xe8   : > { %v3833_v63 = vshll.u32 %v7409_v25, 16  ;;  %v3837_v23 = vshrl.u32 %v7409_v25, 16  ;;  %v8186_v62 = vcombine.low %v7104_v17, %v7108_v57  ;;  %v7437_v44 = vld [vmem:[%s6342_s25 + $0x80] sm:$0x1]  ;;  %v3778_v60 = vrot.slane %v3776_v26, 4 }
  0xe9   : > { %8187 = vst [vmem:[#allocation16_spill] sm:$0xff] %v7437_v44  ;;  %v3802_v31 = vrot.slane %v3800_v4, 4  ;;  %v3805_v8 = vrot.slane %v3803_v27, 5  ;;  %v7441_v10 = vrot.slane %v3809_v3, 5  ;;  %v3815_v51 = vrot.slane %v3813_v50, 4 }
  0xea   : > { %v7444_v25 = vld [vmem:[%s6342_s25 + $0xa0] sm:$0xf]  ;;  %v3826_v17 = vrot.slane %v3824_v52, 4  ;;  %v3829_v57 = vrot.slane %v3827_v53, 5  ;;  %v3851_v9 = vshll.u32 %v5321_v48, 16  ;;  %v3758_v26 = vor.u32 %v3757_v18, %v7402_v33 }
  0xeb   : > { %v3795_v27 = vshll.u32 %v7437_v44, 16  ;;  %v7456_v3 = vld [vmem:[%s6342_s25 + $0x98] sm:$0x1]  ;;  %v3857_v50 = vshll.u32 %v7444_v25, 16  ;;  %v3861_v52 = vshrl.u32 %v7444_v25, 16  ;;  %v3806_v22 = vor.u32 %v3805_v8, %v3802_v31 }
  0xec   : > { %5826 = vmatmul.mubr.msk.bf16.gmra.mrb[28].mxu0 %vm658_vm3, %v6205_v61  ;;  %v7427_v61 = vrot.slane %v3761_v6, 5  ;;  %v3791_v6 = vrot.slane %v3789_v34, 4  ;;  %v3839_v34 = vrot.slane %v3837_v23, 4  ;;  %v3819_v33 = vshll.u32 %v7447_v2, 16 }
  0xed   : > { %5674 = vmatmul.mubr.msk.bf16.gmra.mrb[12].mxu1 %vm658_vm3, %v8185_v7  ;;  %5831 = vmatprep.mubr.msk.bf16.mxu0 %vm658_vm3, %v7169_v20  ;;  %v3781_v7 = vrot.slane %v3779_v49, 5  ;;  %v7439_v20 = vrot.slane %v3785_v46, 5  ;;  %v3771_v49 = vshll.u32 %v7419_v45, 16  ;;  %v7451_v46 = vrot.slane %v3833_v63, 5 }
  0xee   : > { %5677 = vmatprep.mubr.msk.bf16.mxu1 %vm658_vm3, %v8186_v62  ;;  %v3848_v62 = vshrl.u32 %v5321_v48, 16  ;;  %v3768_v4 = vor.u32 %v3767_v59, %v7427_v61  ;;  %v3816_v23 = vor.u32 %v3815_v51, %v7441_v10  ;;  %v3830_v59 = vor.u32 %v3829_v57, %v3826_v17  ;;  %v7489_v57 = vld [vmem:[%s6342_s25 + $0xa4] sm:$0x1] }
  0xef   : > { %v3782_v53 = vor.u32 %v3781_v7, %v3778_v60  ;;  %v3792_v48 = vor.u32 %v3791_v6, %v7439_v20  ;;  %v3853_v18 = vrot.slane %v3851_v9, 5  ;;  %v8188_v44 = vcombine.low %v7116_v11, %v7120_v40 }
  0xf0   : > { %v3850_v63 = vrot.slane %v3848_v62, 4  ;;  %v8189_v31 = vrot.slane %v7378_v54, 5  ;;  %v3773_v51 = vrot.slane %v3771_v49, 5  ;;  %v3840_v60 = vor.u32 %v3839_v34, %v7451_v46  ;;  %v7492_v34 = vld [vmem:[%s6342_s25 + $0xac] sm:$0xf] }
  0xf1   : > { %v3843_v9 = vshll.u32 %v7456_v3, 16  ;;  %v8190_v11 = vcombine.low %v7188_v39, %v7192_v55  ;;  %v3759_v40 = vrot.slane %v3758_v26, 4  ;;  %v7485_v54 = vrot.slane %v3857_v50, 5 }
  0xf2   : > { %v3783_v7 = vrot.slane %v3782_v53, 4  ;;  %v3793_v6 = vrot.slane %v3792_v48, 4  ;;  %v3797_v8 = vrot.slane %v3795_v27, 5  ;;  %v3821_v17 = vrot.slane %v3819_v33, 5  ;;  %v7502_v48 = vld [vmem:[%s6342_s25 + $0xb0] sm:$0x1] }
  0xf3   : > { %v3807_v39 = vrot.slane %v3806_v22, 4  ;;  %v3817_v55 = vrot.slane %v3816_v23, 4  ;;  %v3831_v62 = vrot.slane %v3830_v59, 4  ;;  %v3854_v49 = vor.u32 %v3853_v18, %v3850_v63 }
  0xf4   : > { %5832 = vmatmul.mubr.msk.bf16.vlgmr.msra.gmra.mrb[0].mxu0 %vm658_vm3, %v7232_v16  ;;  %v7475_v16 = vsel %vm6594_vm7, %v7400_v28, %v8189_v31  ;;  %v3863_v28 = vrot.slane %v3861_v52, 4  ;;  %v3845_v26 = vrot.slane %v3843_v9, 5  ;;  %v3764_v52 = vsel %vm6368_vm4, %v3759_v40, %v7427_v61 }
  0xf5   : > { %5678 = vmatmul.mubr.msk.bf16.gmra.mrb[16].mxu1 %vm658_vm3, %v8188_v44  ;;  %5864 = vmatpush3.bf16.msra.mxu0 %v7173_v14  ;;  %v3769_v14 = vrot.slane %v3768_v4, 4  ;;  %v5324_v44 = vld [vmem:[%s6342_s25 + $0xa8] sm:$0xf]  ;;  %v3867_v22 = vshll.u32 %v7489_v57, 16  ;;  %v3788_v33 = vsel %vm6368_vm4, %v3783_v7, %v7439_v20  ;;  %v3798_v23 = vsel %vm6368_vm4, %v3793_v6, %v3797_v8 }
  0xf6   : > { %5681 = vmatprep.mubr.msk.bf16.mxu1 %vm658_vm3, %v8190_v11  ;;  %5835 = vmatprep.mubr.msk.bf16.mxu0 %vm658_vm3, %v7243_v29  ;;  %v3841_v29 = vrot.slane %v3840_v60, 4  ;;  %v3872_v4 = vshrl.u32 %v5324_v44, 16  ;;  %v3875_v50 = vshll.u32 %v5324_v44, 16  ;;  %v3864_v53 = vor.u32 %v3863_v28, %v7485_v54  ;;  %v5373_v11 = vld [vmem:[%s6342_s25 + $0x48] sm:$0xe] }
  0xf7   : > { %v3774_v27 = vsel %vm6368_vm4, %v3769_v14, %v3773_v51  ;;  %v3881_v59 = vshll.u32 %v7492_v34, 16  ;;  %v3885_v61 = vshrl.u32 %v7492_v34, 16  ;;  %v3812_v63 = vsel %vm6368_vm4, %v3807_v39, %v7441_v10  ;;  %v7567_v39 = vld [vmem:[%s6342_s25 + $0xb8] sm:$0xf] }
  0xf8   : > { %v3822_v18 = vsel %vm6368_vm4, %v3817_v55, %v3821_v17  ;;  %v3836_v20 = vsel %vm6368_vm4, %v3831_v62, %v7451_v46  ;;  %v3855_v31 = vrot.slane %v3854_v49, 4  ;;  %v8191_v51 = vcombine.low %v7205_v12, %v7220_v35 }
  0xf9   : > { %v3874_v10 = vrot.slane %v3872_v4, 4  ;;  %v3877_v60 = vrot.slane %v3875_v50, 5  ;;  %v3891_v9 = vshll.u32 %v7502_v48, 16  ;;  %v8192_v46 = vcombine.low %v7290_v21, %v7315_v56  ;;  %v5327_v21 = vld [vmem:[%s6342_s25 + $0xb4] sm:$0xf] }
  0xfa   : > { %v4994_v12 = vcombine.low %v7366_v42, %v7373_v47  ;;  %v8193_v35 = vsel %vm6368_vm4, %v7386_v5, %v7375_v41  ;;  %v3865_v14 = vrot.slane %v3864_v53, 4  ;;  %v3869_v28 = vrot.slane %v3867_v22, 5  ;;  %v5375_v4 = vld [vmem:[%s6342_s25 + $0x60] sm:$0xe]  ;;  %v5376_v53 = vld [vmem:[%s6342_s25 + $0x6c] sm:$0xe] }
  0xfb   : > { %v4995_v56 = vcombine.low %v7390_v43, %v7475_v16  ;;  %v7550_v44 = vcombine.low %v3764_v52, %v3774_v27  ;;  %v7552_v42 = vrot.slane %v3881_v59, 5  ;;  %v3887_v47 = vrot.slane %v3885_v61, 4  ;;  %v8202_v16 = vld [vmem:[#allocation4_spill] sm:$0xff] }
  0xfc   : > { %5836 = vmatmul.mubr.msk.bf16.gmra.mrb[4].mxu0 %vm658_vm3, %v7346_v37  ;;  %v3846_v37 = vsel %vm6368_vm4, %v3841_v29, %v3845_v26  ;;  %v7554_v41 = vcombine.low %v3788_v33, %v3798_v23  ;;  %v7556_v5 = vcombine.low %v3812_v63, %v3822_v18  ;;  %v3860_v6 = vsel %vm6368_vm4, %v3855_v31, %v7485_v54  ;;  %v8195_v23 = vld [vmem:[#allocation11_spill] sm:$0xff]  ;;  %v5330_v63 = vld [vmem:[%s6342_s25 + $0xc0] sm:$0xf]  ;;  %v8197_v18 = vld [vmem:[#allocation9_spill] sm:$0xff] }
  0xfd   : > { %5682 = vmatmul.mubr.msk.bf16.gmra.mrb[20].mxu1 %vm658_vm3, %v8191_v51  ;;  %5839 = vmatprep.mubr.msk.bf16.mxu0 %vm658_vm3, %v7360_v58  ;;  %v8194_v58 = vsel %vm6368_vm4, %v7348_v19, %v7303_v1  ;;  %v7558_v7 = vcombine.low %v3836_v20, %v3846_v37  ;;  %v5389_v1 = vrot.slane %v5373_v11, 9  ;;  %v5374_v19 = vld [vmem:[%s6342_s25 + $0x54] sm:$0xe]  ;;  %v3878_v8 = vor.u32 %v3877_v60, %v3874_v10  ;;  %v8198_v31 = vld [vmem:[#allocation10_spill] sm:$0xff] }
  0xfe   : > { %5685 = vmatprep.mubr.msk.bf16.mxu1 %vm658_vm3, %v8192_v46  ;;  %v5343_v40 = vcombine.low %v8194_v58, %v8193_v35  ;;  %v7564_v17 = vrot.slane %v3891_v9, 5  ;;  %v3896_v55 = vshrl.u32 %v5327_v21, 16  ;;  %v3870_v62 = vsel %vm6368_vm4, %v3865_v14, %v3869_v28  ;;  %v8199_v9 = vld [vmem:[#allocation12_spill] sm:$0xff]  ;;  %v7616_v35 = vld [vmem:[%s6342_s25 + $0xbc] sm:$0x1] }
  0xff   : > { %v3899_v49 = vshll.u32 %v5327_v21, 16  ;;  %v4355_v29 = vrot.slane %v7198_v0, 5  ;;  %v4358_v26 = vrot.slane %v7252_v38, 5  ;;  %v3888_v50 = vor.u32 %v3887_v47, %v7552_v42  ;;  %v7619_v58 = vld [vmem:[%s6342_s25 + $0xc4] sm:$0xf] }
 0x100   : > { %v5390_v52 = vrot.slane %v5374_v19, 9  ;;  %v4362_v54 = vrot.slane %v7209_v24, 5  ;;  %v4365_v27 = vrot.slane %v7261_v15, 5  ;;  %v3905_v22 = vshll.u32 %v7567_v39, 16  ;;  %v5377_v19 = vld [vmem:[%s6342_s25 + $0x78] sm:$0xe] }
 0x101   : > { %v3909_v33 = vshrl.u32 %v7567_v39, 16  ;;  %v7584_v0 = vsel %vm6594_vm7, %v5389_v1, %v4355_v29  ;;  %v4357_v38 = vrot.slane %v4355_v29, 4  ;;  %v8196_v59 = vcombine.low %v7323_v36, %v8195_v23  ;;  %v8200_v23 = vld [vmem:[#allocation13_spill] sm:$0xff] }
 0x102   : > { %v7591_v24 = vcombine.low %v3860_v6, %v3870_v62  ;;  %v7595_v15 = vsel %vm6594_vm7, %v5390_v52, %v4362_v54  ;;  %v5391_v61 = vrot.slane %v5375_v4, 9  ;;  %v4369_v20 = vrot.slane %v8197_v18, 5  ;;  %v6206_v6 = vld [vmem:[%s6342_s25 + $0xc] sm:$0xff]  }
 0x103   : > { %v7601_v36 = vsel %vm6594_vm7, %v4357_v38, %v4358_v26  ;;  %v4372_v51 = vrot.slane %v8198_v31, 5  ;;  %v5392_v37 = vrot.slane %v5376_v53, 9  ;;  %v4376_v11 = vrot.slane %v8199_v9, 5 }
 0x104   : > { %5840 = vmatmul.mubr.msk.bf16.gmra.mrb[8].mxu0 %vm658_vm3, %v7369_v30  ;;  %v4364_v30 = vrot.slane %v4362_v54, 4  ;;  %v5406_v10 = vcombine.low %v7584_v0, %v7601_v36  ;;  %v4379_v46 = vrot.slane %v7419_v45, 5  ;;  %v7625_v14 = vsel %vm6594_vm7, %v5391_v61, %v4369_v20 }
 0x105   : > { %5686 = vmatmul.mubr.msk.bf16.gmra.mrb[24].mxu1 %vm658_vm3, %v8196_v59  ;;  %5843 = vmatprep.mubr.msk.bf16.mxu0 %vm658_vm3, %v5343_v40  ;;  %v4371_v28 = vrot.slane %v4369_v20, 4  ;;  %v7627_v21 = vrot.slane %v3896_v55, 4  ;;  %v3920_v47 = vshrl.u32 %v5330_v63, 16  ;;  %v7631_v45 = vsel %vm6594_vm7, %v5392_v37, %v4376_v11  ;;  %v5104_v55 = vld [vmem:[%s6342_s25 + $0x78] sm:$0xf]  ;;  %v8201_v59 = vld [vmem:[#allocation16_spill] sm:$0xff] }
 0x106   : > { %5689 = vmatprep.mubr.msk.bf16.mxu1 %vm658_vm3, %v4994_v12  ;;  %v7609_v60 = vsel %vm6594_vm7, %v4364_v30, %v4365_v27  ;;  %v7613_v12 = vrot.slane %v3878_v8, 4  ;;  %v4378_v1 = vrot.slane %v4376_v11, 4  ;;  %v7635_v8 = vrot.slane %v3888_v50, 4 }
 0x107   : > { %v5407_v40 = vcombine.low %v7595_v15, %v7609_v60  ;;  %v7637_v62 = vrot.slane %v3899_v49, 5  ;;  %v3923_v29 = vshll.u32 %v5330_v63, 16  ;;  %v7641_v26 = vsel %vm6594_vm7, %v4371_v28, %v4372_v51  ;;  %v8204_v28 = vld [vmem:[#allocation14_spill] sm:$0xff] }
 0x108   : > { %v7644_v4 = vrot.slane %v3905_v22, 5  ;;  %v7646_v52 = vrot.slane %v3909_v33, 4  ;;  %v5408_v54 = vcombine.low %v7625_v14, %v7641_v26  ;;  %v7652_v27 = vsel %vm6594_vm7, %v4378_v1, %v4379_v46  ;;  %v5378_v33 = vld [vmem:[%s6342_s25 + $0x84] sm:$0xe]  ;;  %v6207_v1 = vld [vmem:[%s6342_s25 + $0x18] sm:$0xff]  }
 0x109   : > { %v3915_v49 = vshll.u32 %v7616_v35, 16  ;;  %v3929_v50 = vshll.u32 %v7619_v58, 16  ;;  %v5409_v53 = vcombine.low %v7631_v45, %v7652_v27  ;;  %v5393_v22 = vrot.slane %v5377_v19, 9  ;;  %v6269_v60 = vld [vmem:[%s6342_s25 + $0xa0] sm:$0xf] }
 0x10a   : > { %v3922_v38 = vrot.slane %v3920_v47, 4  ;;  %v4386_v30 = vrot.slane %v8201_v59, 5  ;;  %v2245_v61 = vshrl.u32 %v5104_v55, 16  ;;  %v3925_v63 = vrot.slane %v3923_v29, 5  ;;  %v5333_v29 = vld [vmem:[%s6342_s25 + $0xcc] sm:$0xf] }
 0x10b   : > { %v3933_v18 = vshrl.u32 %v7619_v58, 16  ;;  %v2248_v43 = vshll.u32 %v5104_v55, 16  ;;  %v5394_v37 = vrot.slane %v5378_v33, 9  ;;  %v3884_v9 = vsel %vm6368_vm4, %v7613_v12, %v7552_v42  ;;  %v7695_v55 = vld [vmem:[%s6342_s25 + $0xd0] sm:$0xf] }
 0x10c   : > { %5844 = vmatmul.mubr.msk.bf16.gmra.mrb[12].mxu0 %vm658_vm3, %v7550_v44  ;;  %v4383_v44 = vrot.slane %v8200_v23, 5  ;;  %v2247_v51 = vrot.slane %v2245_v61, 4  ;;  %v3902_v11 = vor.u32 %v7637_v62, %v7627_v21  ;;  %v4390_v47 = vrot.slane %v8204_v28, 5  ;;  %v6208_v21 = vld [vmem:[%s6342_s25 + $0x24] sm:$0xff]   ;;  %v6273_v27 = vld [vmem:[%s6342_s25 + $0xac] sm:$0xf] }
 0x10d   : > { %5690 = vmatmul.mubr.msk.bf16.gmra.mrb[28].mxu1 %vm658_vm3, %v4995_v56  ;;  %5847 = vmatprep.mubr.msk.bf16.mxu0 %vm658_vm3, %v7554_v41  ;;  %v8203_v56 = vld [vmem:[#allocation5_spill] sm:$0xff]  ;;  %v2250_v46 = vrot.slane %v2248_v43, 5  ;;  %v3894_v19 = vsel %vm6368_vm4, %v7635_v8, %v7564_v17  ;;  %v4393_v12 = vrot.slane %v7447_v2, 5  ;;  %v7703_v62 = vrot.slane %v3929_v50, 5  ;;  %v5379_v8 = vld [vmem:[%s6342_s25 + $0x90] sm:$0xe] }
 0x10e   : > { %5695 = vmatprep.mubr.msk.bf16.mxu1 %vm658_vm3, %v6206_v6  ;;  %v2267_v41 = vsel %vm6368_vm4, %v8203_v56, %v8202_v16  ;;  %v7677_v20 = vsel %vm6594_vm7, %v5393_v22, %v4383_v44  ;;  %v4385_v31 = vrot.slane %v4383_v44, 4  ;;  %v3912_v6 = vor.u32 %v7646_v52, %v7644_v4  ;;  %v7709_v52 = vld [vmem:[%s6342_s25 + $0xc8] sm:$0x1]  ;;  %v8206_v16 = vld [vmem:[#allocation2_spill] sm:$0xff] }
 0x10f   : > { %v3935_v22 = vrot.slane %v3933_v18, 4  ;;  %v2251_v17 = vor.u32 %v2250_v46, %v2247_v51  ;;  %v3917_v23 = vrot.slane %v3915_v49, 5  ;;  %v3926_v44 = vor.u32 %v3925_v63, %v3922_v38  ;;  %v8207_v51 = vld [vmem:[#allocation3_spill] sm:$0xff] }
 0x110   : > { %v7699_v42 = vsel %vm6594_vm7, %v4385_v31, %v4386_v30  ;;  %v7713_v59 = vsel %vm6594_vm7, %v5394_v37, %v4390_v47  ;;  %v4392_v30 = vrot.slane %v4390_v47, 4  ;;  %v3944_v2 = vshrl.u32 %v5333_v29, 16 }
 0x111   : > { %v5410_v33 = vcombine.low %v7677_v20, %v7699_v42  ;;  %v3947_v50 = vshll.u32 %v5333_v29, 16  ;;  %v3953_v61 = vshll.u32 %v7695_v55, 16  ;;  %v2252_v18 = vrot.slane %v2251_v17, 4  ;;  %v6209_v29 = vld [vmem:[%s6342_s25 + $0x30] sm:$0xff]  }
 0x112   : > { %v3957_v49 = vshrl.u32 %v7695_v55, 16  ;;  %v7724_v38 = vsel %vm6594_vm7, %v4392_v30, %v4393_v12  ;;  %v5395_v63 = vrot.slane %v5379_v8, 9  ;;  %v3936_v56 = vor.u32 %v3935_v22, %v7703_v62 }
 0x113   : > { %v3939_v31 = vshll.u32 %v7709_v52, 16  ;;  %v5411_v37 = vcombine.low %v7713_v59, %v7724_v38  ;;  %v5349_v46 = vcombine.low %v3884_v9, %v3894_v19  ;;  %v3903_v28 = vrot.slane %v3902_v11, 4  ;;  %v5380_v11 = vld [vmem:[%s6342_s25 + $0x9c] sm:$0xe] }
 0x114   : > { %5848 = vmatmul.mubr.msk.bf16.gmra.mrb[16].mxu0 %vm658_vm3, %v7556_v5  ;;  %v8205_v5 = vld [vmem:[#allocation15_spill] sm:$0xff]  ;;  %v3913_v47 = vrot.slane %v3912_v6, 4  ;;  %v3927_v12 = vrot.slane %v3926_v44, 4  ;;  %v4400_v8 = vrot.slane %v7456_v3, 5  ;;  %v3946_v30 = vrot.slane %v3944_v2, 4  ;;  %v6210_v19 = vld [vmem:[%s6342_s25 + $0x3c] sm:$0xff]  }
 0x115   : > { %5696 = vmatmul.mubr.msk.bf16.vlgmr.msra.gmra.mrb[0].mxu1 %vm658_vm3, %v6207_v1  ;;  %5851 = vmatprep.mubr.msk.bf16.mxu0 %vm658_vm3, %v7558_v7  ;;  %v4397_v43 = vrot.slane %v8205_v5, 5  ;;  %v2257_v7 = vsel %vm6368_vm4, %v2252_v18, %v8207_v51  ;;  %v3949_v18 = vrot.slane %v3947_v50, 5  ;;  %v7747_v5 = vrot.slane %v3953_v61, 5 }
 0x116   : > { %5898 = vmatpush3.bf16.msra.mxu1 %v8206_v16  ;;  %5699 = vmatprep.mubr.msk.bf16.mxu1 %vm658_vm3, %v6208_v21  ;;  %v7736_v1 = vcombine.low %v2257_v7, %v2267_v41  ;;  %v7740_v21 = vld [vmem:[%s6342_s25 + $0xd4] sm:$0x1]  ;;  %v3959_v9 = vrot.slane %v3957_v49, 4  ;;  %v3937_v41 = vrot.slane %v3936_v56, 4  ;;  %v3941_v6 = vrot.slane %v3939_v31, 5 }
 0x117   : > { %v7744_v22 = vsel %vm6594_vm7, %v5395_v63, %v4397_v43  ;;  %v4399_v17 = vrot.slane %v4397_v43, 4  ;;  %v3908_v63 = vsel %vm6368_vm4, %v3903_v28, %v7644_v4  ;;  %v3918_v2 = vsel %vm6368_vm4, %v3913_v47, %v3917_v23  ;;  %v6260_v16 = vld [vmem:[%s6342_s25 + $0x1c] sm:$0xf]  ;;  %v5381_v28 = vld [vmem:[%s6342_s25 + $0xa8] sm:$0xe] }
 0x118   : > { %v3963_v50 = vshll.u32 %v7740_v21, 16  ;;  %v5396_v61 = vrot.slane %v5380_v11, 9  ;;  %v4404_v49 = vrot.slane %v7444_v25, 5  ;;  %v3932_v4 = vsel %vm6368_vm4, %v3927_v12, %v7703_v62  ;;  %v5369_v62 = vld [vmem:[%s6342_s25 + $0x18] sm:$0xe]  ;;  %v6211_v47 = vld [vmem:[%s6342_s25 + $0x48] sm:$0xff]  }
 0x119   : > { %v7753_v44 = vsel %vm6594_vm7, %v4399_v17, %v4400_v8  ;;  %v3960_v43 = vor.u32 %v3959_v9, %v7747_v5  ;;  %v4407_v23 = vrot.slane %v7489_v57, 5  ;;  %v3942_v25 = vsel %vm6368_vm4, %v3937_v41, %v3941_v6  ;;  %v6261_v11 = vld [vmem:[%s6342_s25 + $0x20] sm:$0x1] }
 0x11a   : > { %v5412_v3 = vcombine.low %v7744_v22, %v7753_v44  ;;  %v4327_v56 = vrot.slane %v6260_v16, 5  ;;  %v7779_v31 = vsel %vm6594_vm7, %v5396_v61, %v4404_v49  ;;  %v4406_v51 = vrot.slane %v4404_v49, 4  ;;  %v5382_v49 = vld [vmem:[%s6342_s25 + $0xb4] sm:$0xe] }
 0x11b   : > { %v5350_v7 = vcombine.low %v3908_v63, %v3918_v2  ;;  %v3961_v17 = vrot.slane %v3960_v43, 4  ;;  %v5397_v41 = vrot.slane %v5381_v28, 9  ;;  %v4411_v6 = vrot.slane %v7492_v34, 5  ;;  %v5370_v2 = vld [vmem:[%s6342_s25 + $0x24] sm:$0xe] }
 0x11c   : > { %5852 = vmatmul.mubr.msk.bf16.gmra.mrb[20].mxu0 %vm658_vm3, %v7591_v24  ;;  %v3950_v24 = vor.u32 %v3949_v18, %v3946_v30  ;;  %v7784_v57 = vsel %vm6594_vm7, %v4406_v51, %v4407_v23  ;;  %v6212_v30 = vld [vmem:[%s6342_s25 + $0x54] sm:$0xff]   ;;  %v5385_v18 = vrot.slane %v5369_v62, 9  ;;  %v4329_v9 = vrot.slane %v4327_v56, 4  ;;  %v6264_v28 = vld [vmem:[%s6342_s25 + $0x2c] sm:$0x1] }
 0x11d   : > { %5700 = vmatmul.mubr.msk.bf16.gmra.mrb[4].mxu1 %vm658_vm3, %v6209_v29  ;;  %5855 = vmatprep.mubr.msk.bf16.mxu0 %vm658_vm3, %v5349_v46  ;;  %v3965_v46 = vrot.slane %v3963_v50, 5  ;;  %v5351_v29 = vcombine.low %v3932_v4, %v3942_v25  ;;  %v5413_v8 = vcombine.low %v7779_v31, %v7784_v57  ;;  %v4414_v63 = vrot.slane %v7502_v48, 5  ;;  %v6262_v50 = vld [vmem:[%s6342_s25 + $0x28] sm:$0xf]  ;;  %v5371_v25 = vld [vmem:[%s6342_s25 + $0x30] sm:$0xe] }
 0x11e   : > { %5703 = vmatprep.mubr.msk.bf16.mxu1 %vm658_vm3, %v6210_v19  ;;  %v3951_v12 = vrot.slane %v3950_v24, 4  ;;  %v4330_v19 = vrot.slane %v6261_v11, 5  ;;  %v4334_v61 = vrot.slane %v6262_v50, 5  ;;  %v7807_v48 = vsel %vm6594_vm7, %v5397_v41, %v4411_v6  ;;  %v6214_v11 = vld [vmem:[%s6342_s25 + $0x6c] sm:$0xff]   ;;  %v8208_v41 = vld [vmem:[#allocation6_spill] sm:$0xff] }
 0x11f   : > { %v3966_v34 = vsel %vm6368_vm4, %v3961_v17, %v3965_v46  ;;  %v4413_v24 = vrot.slane %v4411_v6, 4  ;;  %v4328_v43 = vsel %vm6594_vm7, %v5385_v18, %v4327_v56  ;;  %v5386_v51 = vrot.slane %v5370_v2, 9  ;;  %v5383_v50 = vld [vmem:[%s6342_s25 + $0xc0] sm:$0xe]  ;;  %v6278_v31 = vld [vmem:[%s6342_s25 + $0xc8] sm:$0x1] }
 0x120   : > { %v3956_v4 = vsel %vm6368_vm4, %v3951_v12, %v7747_v5  ;;  %v4331_v23 = vsel %vm6594_vm7, %v4329_v9, %v4330_v19  ;;  %v6263_v5 = vld [vmem:[%s6342_s25 + $0x34] sm:$0xf]  ;;  %v6213_v12 = vld [vmem:[%s6342_s25 + $0x60] sm:$0xff]   ;;  %v5387_v18 = vrot.slane %v5371_v25, 9  ;;  %v4421_v9 = vrot.slane %v7616_v35, 5 }
 0x121   : > { %v4341_v16 = vrot.slane %v6263_v5, 5  ;;  %v7818_v62 = vsel %vm6594_vm7, %v4413_v24, %v4414_v63  ;;  %v5352_v46 = vcombine.low %v3956_v4, %v3966_v34  ;;  %v5402_v17 = vcombine.low %v4328_v43, %v4331_v23  ;;  %v5372_v24 = vld [vmem:[%s6342_s25 + $0x3c] sm:$0xe] }
 0x122   : > { %v5414_v56 = vcombine.low %v7807_v48, %v7818_v62  ;;  %v4344_v6 = vrot.slane %v8208_v41, 5  ;;  %v4335_v35 = vsel %vm6594_vm7, %v5386_v51, %v4334_v61  ;;  %v5399_v5 = vrot.slane %v5383_v50, 9 }
 0x123   : > { %v4343_v19 = vrot.slane %v4341_v16, 4  ;;  %v4342_v23 = vsel %vm6594_vm7, %v5387_v18, %v4341_v16  ;;  %v4428_v51 = vrot.slane %v7709_v52, 5  ;;  %v2408_v57 = vshll.u32 %v6278_v31, 16 }
 0x124   : > { %5856 = vmatmul.mubr.msk.bf16.gmra.mrb[24].mxu0 %vm658_vm3, %v5350_v7  ;;  %v5398_v7 = vrot.slane %v5382_v49, 9 }
 0x125   : > { %5704 = vmatmul.mubr.msk.bf16.gmra.mrb[8].mxu1 %vm658_vm3, %v6211_v47  ;;  %5859 = vmatprep.mubr.msk.bf16.mxu0 %vm658_vm3, %v5351_v29  ;;  %v4337_v47 = vrot.slane %v6264_v28, 5  ;;  %v4418_v29 = vrot.slane %v7567_v39, 5  ;;  %v8209_v39 = vld [vmem:[#allocation7_spill] sm:$0xff]  ;;  %v4345_v25 = vsel %vm6594_vm7, %v4343_v19, %v4344_v6  ;;  %v5388_v28 = vrot.slane %v5372_v24, 9 }
 0x126   : > { %5707 = vmatprep.mubr.msk.bf16.mxu1 %vm658_vm3, %v6212_v30  ;;  %v4336_v30 = vrot.slane %v4334_v61, 4  ;;  %v4348_v49 = vrot.slane %v8209_v39, 5  ;;  %v4425_v61 = vrot.slane %v7619_v58, 5  ;;  %v6265_v39 = vld [vmem:[%s6342_s25 + $0x70] sm:$0xf]  ;;  %v4432_v24 = vrot.slane %v7695_v55, 5 }
 0x127   : > { %v7830_v63 = vsel %vm6594_vm7, %v5398_v7, %v4418_v29  ;;  %v4420_v2 = vrot.slane %v4418_v29, 4  ;;  %v5101_v7 = vld [vmem:[%s6342_s25 + $0x6c] sm:$0xf]  ;;  %v8210_v29 = vld [vmem:[#allocation8_spill] sm:$0xff] }
 0x128   : > { %v4338_v34 = vsel %vm6594_vm7, %v4336_v30, %v4337_v47  ;;  %v4350_v47 = vrot.slane %v4348_v49, 4  ;;  %v6215_v30 = vld [vmem:[%s6342_s25 + $0x78] sm:$0xff]   ;;  %v7861_v16 = vsel %vm6594_vm7, %v5399_v5, %v4425_v61  ;;  %v4427_v18 = vrot.slane %v4425_v61, 4 }
 0x129   : > { %v7837_v4 = vsel %vm6594_vm7, %v4420_v2, %v4421_v9  ;;  %v5404_v9 = vcombine.low %v4342_v23, %v4345_v25  ;;  %v2221_v19 = vshrl.u32 %v5101_v7, 16  ;;  %v2224_v41 = vshll.u32 %v5101_v7, 16 }
 0x12a   : > { %v5415_v43 = vcombine.low %v7830_v63, %v7837_v4  ;;  %v7866_v58 = vsel %vm6594_vm7, %v4427_v18, %v4428_v51  ;;  %v4349_v6 = vsel %vm6594_vm7, %v5388_v28, %v4348_v49  ;;  %v4435_v49 = vrot.slane %v7740_v21, 5  ;;  %v6217_v51 = vld [vmem:[%s6342_s25 + $0x90] sm:$0xff]   ;;  %v6218_v21 = vld [vmem:[%s6342_s25 + $0x9c] sm:$0xff]  }
 0x12b   : > { %v5416_v50 = vcombine.low %v7861_v16, %v7866_v58  ;;  %v2223_v23 = vrot.slane %v2221_v19, 4  ;;  %v2226_v25 = vrot.slane %v2224_v41, 5  ;;  %v4434_v7 = vrot.slane %v4432_v24, 4 }
 0x12c   : > { %5860 = vmatmul.mubr.msk.bf16.gmra.mrb[28].mxu0 %vm658_vm3, %v5352_v46  ;;  %v5403_v46 = vcombine.low %v4335_v35, %v4338_v34  ;;  %v2230_v35 = vshll.u32 %v6265_v39, 16  ;;  %v2234_v34 = vshrl.u32 %v6265_v39, 16 }
 0x12d   : > { %5708 = vmatmul.mubr.msk.bf16.gmra.mrb[12].mxu1 %vm658_vm3, %v6213_v12  ;;  %5865 = vmatprep.mubr.msk.bf16.mxu0 %vm658_vm3, %v5402_v17  ;;  %v4351_v12 = vrot.slane %v8210_v29, 5  ;;  %v5384_v17 = vld [vmem:[%s6342_s25 + $0xcc] sm:$0xe]  ;;  %v7888_v55 = vsel %vm6594_vm7, %v4434_v7, %v4435_v49 }
 0x12e   : > { %5711 = vmatprep.mubr.msk.bf16.mxu1 %vm658_vm3, %v6214_v11  ;;  %v6216_v11 = vld [vmem:[%s6342_s25 + $0x84] sm:$0xff]   ;;  %v5400_v52 = vrot.slane %v5384_v17, 9  ;;  %v2236_v28 = vrot.slane %v2234_v34, 4  ;;  %v6266_v17 = vld [vmem:[%s6342_s25 + $0x74] sm:$0x1] }
 0x12f   : > { %v4352_v2 = vsel %vm6594_vm7, %v4350_v47, %v4351_v12  ;;  %v5107_v47 = vld [vmem:[%s6342_s25 + $0x84] sm:$0xf]  ;;  %v2227_v12 = vor.u32 %v2226_v25, %v2223_v23  ;;  %v6220_v34 = vld [vmem:[%s6342_s25 + $0xb4] sm:$0xff]  }
 0x130   : > { %v7883_v5 = vsel %vm6594_vm7, %v5400_v52, %v4432_v24  ;;  %v5405_v61 = vcombine.low %v4349_v6, %v4352_v2  ;;  %v2272_v18 = vshll.u32 %v5107_v47, 16  ;;  %v5110_v6 = vld [vmem:[%s6342_s25 + $0x90] sm:$0xf]  ;;  %v6219_v2 = vld [vmem:[%s6342_s25 + $0xa8] sm:$0xff]  }
 0x131   : > { %v5417_v29 = vcombine.low %v7883_v5, %v7888_v55  ;;  %v2228_v52 = vrot.slane %v2227_v12, 4  ;;  %v2293_v23 = vshrl.u32 %v5110_v6, 16  ;;  %v2296_v25 = vshll.u32 %v5110_v6, 16 }
 0x132   : > { %v2326_v12 = vshll.u32 %v6269_v60, 16 }
 0x133   : > { %v2298_v14 = vrot.slane %v2296_v25, 5  ;;  %v6272_v25 = vld [vmem:[%s6342_s25 + $0xa4] sm:$0x1] }
 0x134   : > { %5866 = vmatmul.mubr.msk.bf16.vlgmr.msra.gmra.mrb[0].mxu0 %vm658_vm3, %v5403_v46  ;;  %v2232_v46 = vrot.slane %v2230_v35, 5  ;;  %v5113_v35 = vld [vmem:[%s6342_s25 + $0x9c] sm:$0xf]  ;;  %v7930_v6 = vrot.slane %v2326_v12, 5 }
 0x135   : > { %5712 = vmatmul.mubr.msk.bf16.gmra.mrb[16].mxu1 %vm658_vm3, %v6215_v30  ;;  %5869 = vmatprep.mubr.msk.bf16.mxu0 %vm658_vm3, %v5404_v9  ;;  %v2240_v30 = vshll.u32 %v6266_v17, 16  ;;  %v2269_v9 = vshrl.u32 %v5107_v47, 16  ;;  %v2320_v47 = vshll.u32 %v5113_v35, 16  ;;  %v6270_v17 = vld [vmem:[%s6342_s25 + $0x8c] sm:$0x1] }
 0x136   : > { %5715 = vmatprep.mubr.msk.bf16.mxu1 %vm658_vm3, %v6216_v11  ;;  %v2237_v13 = vor.u32 %v2236_v28, %v2232_v46  ;;  %v6267_v11 = vld [vmem:[%s6342_s25 + $0x88] sm:$0xf]  ;;  %v2233_v7 = vsel %vm6368_vm4, %v2228_v52, %v2232_v46 }
 0x137   : > { %v2278_v19 = vshll.u32 %v6267_v11, 16  ;;  %v2282_v41 = vshrl.u32 %v6267_v11, 16  ;;  %v2242_v0 = vrot.slane %v2240_v30, 5  ;;  %v2271_v36 = vrot.slane %v2269_v9, 4 }
 0x138   : > { %v2238_v39 = vrot.slane %v2237_v13, 4  ;;  %v2288_v30 = vshll.u32 %v6270_v17, 16  ;;  %v2295_v9 = vrot.slane %v2293_v23, 4  ;;  %v2322_v11 = vrot.slane %v2320_v47, 5 }
 0x139   : > { %v7907_v24 = vrot.slane %v2278_v19, 5  ;;  %v2284_v49 = vrot.slane %v2282_v41, 4  ;;  %v6221_v19 = vld [vmem:[%s6342_s25 + $0xc0] sm:$0xff]  }
 0x13a   : > { %v2243_v46 = vsel %vm6368_vm4, %v2238_v39, %v2242_v0  ;;  %v5116_v39 = vld [vmem:[%s6342_s25 + $0xa8] sm:$0xf] }
 0x13b   : > { %v2285_v13 = vor.u32 %v2284_v49, %v7907_v24  ;;  %v5134_v41 = vcombine.low %v2233_v7, %v2243_v46  ;;  %v2336_v7 = vshll.u32 %v6272_v25, 16  ;;  %v2344_v45 = vshll.u32 %v5116_v39, 16 }
 0x13c   : > { %5870 = vmatmul.mubr.msk.bf16.gmra.mrb[4].mxu0 %vm658_vm3, %v5405_v61  ;;  %v6268_v61 = vld [vmem:[%s6342_s25 + $0x94] sm:$0xf] }
 0x13d   : > { %5716 = vmatmul.mubr.msk.bf16.gmra.mrb[20].mxu1 %vm658_vm3, %v6217_v51  ;;  %5873 = vmatprep.mubr.msk.bf16.mxu0 %vm658_vm3, %v5406_v10  ;;  %v2274_v10 = vrot.slane %v2272_v18, 5  ;;  %v2302_v51 = vshll.u32 %v6268_v61, 16  ;;  %v2306_v28 = vshrl.u32 %v6268_v61, 16  ;;  %v2286_v0 = vrot.slane %v2285_v13, 4 }
 0x13e   : > { %5719 = vmatprep.mubr.msk.bf16.mxu1 %vm658_vm3, %v6218_v21  ;;  %v2317_v21 = vshrl.u32 %v5113_v35, 16  ;;  %v6271_v35 = vld [vmem:[%s6342_s25 + $0x98] sm:$0x1]  ;;  %v2341_v61 = vshrl.u32 %v5116_v39, 16  ;;  %v5122_v39 = vld [vmem:[%s6342_s25 + $0xc0] sm:$0xf] }
 0x13f   : > { %v2275_v15 = vor.u32 %v2274_v10, %v2271_v36  ;;  %v7927_v26 = vrot.slane %v2302_v51, 5  ;;  %v2290_v36 = vrot.slane %v2288_v30, 5  ;;  %v2299_v10 = vor.u32 %v2298_v14, %v2295_v9  ;;  %v5119_v51 = vld [vmem:[%s6342_s25 + $0xb4] sm:$0xf] }
 0x140   : > { %v2319_v18 = vrot.slane %v2317_v21, 4  ;;  %v2354_v21 = vshrl.u32 %v6273_v27, 16  ;;  %v2365_v20 = vshrl.u32 %v5119_v51, 16  ;;  %v2368_v42 = vshll.u32 %v5119_v51, 16 }
 0x141   : > { %v2276_v52 = vrot.slane %v2275_v15, 4  ;;  %v2291_v46 = vsel %vm6368_vm4, %v2286_v0, %v2290_v36  ;;  %v2300_v15 = vrot.slane %v2299_v10, 4  ;;  %v2338_v30 = vrot.slane %v2336_v7, 5 }
 0x142   : > { %v2323_v23 = vor.u32 %v2322_v11, %v2319_v18  ;;  %v2343_v9 = vrot.slane %v2341_v61, 4  ;;  %v2356_v11 = vrot.slane %v2354_v21, 4  ;;  %v6277_v61 = vld [vmem:[%s6342_s25 + $0xbc] sm:$0x1] }
 0x143   : > { %v2281_v47 = vsel %vm6368_vm4, %v2276_v52, %v7907_v24  ;;  %v2305_v0 = vsel %vm6368_vm4, %v2300_v15, %v7927_v26  ;;  %v2384_v22 = vshll.u32 %v6277_v61, 16 }
 0x144   : > { %5874 = vmatmul.mubr.msk.bf16.gmra.mrb[8].mxu0 %vm658_vm3, %v5407_v40  ;;  %v2330_v40 = vshrl.u32 %v6269_v60, 16  ;;  %v2324_v17 = vrot.slane %v2323_v23, 4  ;;  %v5136_v24 = vcombine.low %v2281_v47, %v2291_v46 }
 0x145   : > { %5720 = vmatmul.mubr.msk.bf16.gmra.mrb[24].mxu1 %vm658_vm3, %v6219_v2  ;;  %5877 = vmatprep.mubr.msk.bf16.mxu0 %vm658_vm3, %v5408_v54  ;;  %v2308_v54 = vrot.slane %v2306_v28, 4 }
 0x146   : > { %5723 = vmatprep.mubr.msk.bf16.mxu1 %vm658_vm3, %v6220_v34  ;;  %v2332_v2 = vrot.slane %v2330_v40, 4  ;;  %v2312_v34 = vshll.u32 %v6271_v35, 16  ;;  %v2329_v10 = vsel %vm6368_vm4, %v2324_v17, %v7930_v6  ;;  %v2410_v17 = vrot.slane %v2408_v57, 5 }
 0x147   : > { %v2309_v49 = vor.u32 %v2308_v54, %v7927_v26  ;;  %v2346_v54 = vrot.slane %v2344_v45, 5  ;;  %v6275_v26 = vld [vmem:[%s6342_s25 + $0xb0] sm:$0x1] }
 0x148   : > { %v2333_v28 = vor.u32 %v2332_v2, %v7930_v6  ;;  %v2314_v60 = vrot.slane %v2312_v34, 5  ;;  %v2360_v35 = vshll.u32 %v6275_v26, 16  ;;  %v2389_v34 = vshrl.u32 %v5122_v39, 16 }
 0x149   : > { %v2310_v13 = vrot.slane %v2309_v49, 4  ;;  %v2347_v38 = vor.u32 %v2346_v54, %v2343_v9  ;;  %v2392_v6 = vshll.u32 %v5122_v39, 16  ;;  %v6276_v49 = vld [vmem:[%s6342_s25 + $0xc4] sm:$0xf] }
 0x14a   : > { %v2334_v14 = vrot.slane %v2333_v28, 4  ;;  %v2398_v23 = vshll.u32 %v6276_v49, 16  ;;  %v2402_v25 = vshrl.u32 %v6276_v49, 16  ;;  %v2362_v45 = vrot.slane %v2360_v35, 5 }
 0x14b   : > { %v2315_v36 = vsel %vm6368_vm4, %v2310_v13, %v2314_v60  ;;  %v2348_v51 = vrot.slane %v2347_v38, 4  ;;  %v2386_v60 = vrot.slane %v2384_v22, 5 }
 0x14c   : > { %5878 = vmatmul.mubr.msk.bf16.gmra.mrb[12].mxu0 %vm658_vm3, %v5409_v53  ;;  %v2350_v53 = vshll.u32 %v6273_v27, 16  ;;  %v2339_v59 = vsel %vm6368_vm4, %v2334_v14, %v2338_v30  ;;  %v5137_v44 = vcombine.low %v2305_v0, %v2315_v36  ;;  %v2391_v27 = vrot.slane %v2389_v34, 4 }
 0x14d   : > { %5724 = vmatmul.mubr.msk.bf16.gmra.mrb[28].mxu1 %vm658_vm3, %v6221_v19  ;;  %5881 = vmatprep.mubr.msk.bf16.mxu0 %vm658_vm3, %v5410_v33  ;;  %v6274_v33 = vld [vmem:[%s6342_s25 + $0xb8] sm:$0xf]  ;;  %v2367_v19 = vrot.slane %v2365_v20, 4  ;;  %v2400_v21 = vrot.slane %v2398_v23, 5  ;;  %v2404_v47 = vrot.slane %v2402_v25, 4 }
 0x14e   : > { %5745 = vmatprep.mubr.msk.bf16.mxu1 %vm658_vm3, %v5134_v41  ;;  %v2374_v12 = vshll.u32 %v6274_v33, 16  ;;  %v2378_v40 = vshrl.u32 %v6274_v33, 16  ;;  %v2352_v18 = vrot.slane %v2350_v53, 5  ;;  %v2370_v41 = vrot.slane %v2368_v42, 5 }
 0x14f   : > { %v2394_v53 = vrot.slane %v2392_v6, 5 }
 0x150   : > { %v2376_v52 = vrot.slane %v2374_v12, 5  ;;  %v2380_v2 = vrot.slane %v2378_v40, 4  ;;  %v2353_v20 = vsel %vm6368_vm4, %v2348_v51, %v2352_v18  ;;  %v2405_v12 = vor.u32 %v2404_v47, %v2400_v21 }
 0x151   : > { %v2395_v33 = vor.u32 %v2394_v53, %v2391_v27 }
 0x152   : > { %v2381_v7 = vor.u32 %v2380_v2, %v2376_v52  ;;  %v2406_v13 = vrot.slane %v2405_v12, 4  ;;  %v8029_v2 = vld [vmem:[%s8142_s2] ss:$0 sm:$0xff] }
 0x153   : > { %v2396_v40 = vrot.slane %v2395_v33, 4 }
 0x154   : > { %5882 = vmatmul.mubr.msk.bf16.gmra.mrb[16].mxu0 %vm658_vm3, %v5411_v37  ;;  %v2357_v37 = vor.u32 %v2356_v11, %v2352_v18  ;;  %v2382_v15 = vrot.slane %v2381_v7, 4  ;;  %v2411_v9 = vsel %vm6368_vm4, %v2406_v13, %v2410_v17 }
 0x155   : > { %5746 = vmatmul.mubr.msk.bf16.vlgmr.msra.gmra.mrb[16].mxu1 %vm658_vm3, %v7736_v1  ;;  %5885 = vmatprep.mubr.msk.bf16.mxu0 %vm658_vm3, %v5412_v3  ;;  %v2371_v1 = vor.u32 %v2370_v41, %v2367_v19  ;;  %v5138_v3 = vcombine.low %v2329_v10, %v2339_v59  ;;  %v2401_v30 = vsel %vm6368_vm4, %v2396_v40, %v2400_v21 }
 0x156   : > { %5749 = vmatprep.mubr.msk.bf16.mxu1 %vm658_vm3, %v5136_v24  ;;  %v2358_v28 = vrot.slane %v2357_v37, 4  ;;  %v2387_v48 = vsel %vm6368_vm4, %v2382_v15, %v2386_v60  ;;  %v5141_v14 = vcombine.low %v2401_v30, %v2411_v9 }
 0x157   : > { %v2372_v46 = vrot.slane %v2371_v1, 4 }
 0x158   : > { %v2363_v42 = vsel %vm6368_vm4, %v2358_v28, %v2362_v45 }
 0x159   : > { %v5139_v62 = vcombine.low %v2353_v20, %v2363_v42 }
 0x15c   : > { %5886 = vmatmul.mubr.msk.bf16.gmra.mrb[20].mxu0 %vm658_vm3, %v5413_v8  ;;  %v2377_v8 = vsel %vm6368_vm4, %v2372_v46, %v2376_v52 }
 0x15d   : > { %5750 = vmatmul.mubr.msk.bf16.gmra.mrb[20].mxu1 %vm658_vm3, %v5137_v44  ;;  %5889 = vmatprep.mubr.msk.bf16.mxu0 %vm658_vm3, %v5414_v56  ;;  %v5140_v56 = vcombine.low %v2377_v8, %v2387_v48 }
 0x15e   : > { %5753 = vmatprep.mubr.msk.bf16.mxu1 %vm658_vm3, %v5138_v3 }
 0x164   : > { %5890 = vmatmul.mubr.msk.bf16.gmra.mrb[24].mxu0 %vm658_vm3, %v5415_v43 }
 0x165   : > { %5754 = vmatmul.mubr.msk.bf16.gmra.mrb[24].mxu1 %vm658_vm3, %v5139_v62  ;;  %5893 = vmatprep.mubr.msk.bf16.mxu0 %vm658_vm3, %v5416_v50 }
 0x166   : > { %5757 = vmatprep.mubr.msk.bf16.mxu1 %vm658_vm3, %v5140_v56 }
 0x16c   : > { %5894 = vmatmul.mubr.msk.bf16.gmra.mrb[28].mxu0 %vm658_vm3, %v5417_v29 }
 0x16d   : > { %5758 = vmatmul.mubr.msk.bf16.gmra.mrb[28].mxu1 %vm658_vm3, %v5141_v14 }
 0x1e8   : > { %v5697_v63 = vpop.f32.mrb[0].mxu1 }
 0x1e9   : > { %v1821_v4 = vpop.f32.mrb[1].mxu1 }
 0x1ea   : > { %v5698_v43 = vpop.f32.mrb[2].mxu1 }
 0x1eb   : > { %v1824_v16 = vpop.f32.mrb[3].mxu1 }
 0x1f0   : > { %v5701_v58 = vpop.f32.mrb[4].mxu1 }
 0x1f1   : > { %v1837_v50 = vpop.f32.mrb[5].mxu1 }
 0x1f2   : > { %v5702_v54 = vpop.f32.mrb[6].mxu1 }
 0x1f3   : > { %v1840_v18 = vpop.f32.mrb[7].mxu1 }
 0x1f8   : > { %v5705_v11 = vpop.f32.mrb[8].mxu1 }
 0x1f9   : > { %v1853_v32 = vpop.f32.mrb[9].mxu1 }
 0x1fa   : > { %v5706_v24 = vpop.f32.mrb[10].mxu1 }
 0x1fb   : > { %v1856_v19 = vpop.f32.mrb[11].mxu1 }
 0x200   : > { %v8018_v41 = vpop.f32.mrb[12].mxu1 }
 0x201   : > { %v8020_v5 = vpop.f32.mrb[13].mxu1 }
 0x202   : > { %v8022_v55 = vpop.f32.mrb[14].mxu1 }
 0x203   : > { %v8024_v29 = vpop.f32.mrb[15].mxu1 }
 0x207   : > { %v5867_v52 = vpop.f32.mrb[0].mxu0 }
 0x208   : > { %v5899_v39 = vadd.f32 %v5867_v52, %v5697_v63  ;;  %v4572_v0 = vpop.f32.mrb[1].mxu0 }
 0x209   : > { %v5900_v36 = vadd.f32 %v4572_v0, %v1821_v4  ;;  %v5868_v10 = vpop.f32.mrb[2].mxu0 }
 0x20a   : > { %v4740_v59 = vadd.f32 %v5899_v39, %v8029_v2  ;;  %v5901_v38 = vadd.f32 %v5868_v10, %v5698_v43  ;;  %v4575_v37 = vpop.f32.mrb[3].mxu0 }
 0x20b   : > { %v4738_v26 = vadd.f32 %v5900_v36, %v8029_v2  ;;  %v5902_v35 = vadd.f32 %v4575_v37, %v1824_v16 }
 0x20c   : > { %v4772_v34 = vmax.f32 %v4740_v59, 0.0  ;;  %v4741_v6 = vadd.f32 %v5901_v38, %v8029_v2 }
 0x20d   : > { %v4770_v49 = vmax.f32 %v4738_v26, 0.0  ;;  %v4739_v23 = vadd.f32 %v5902_v35, %v8029_v2 }
 0x20e   : > { %4805 = vst.msk [vmem:[%s8036_s20 + $0x10] sm:$0xff] %vm4802_vm8, %v4772_v34  ;;  %v4773_v25 = vmax.f32 %v4741_v6, 0.0 }
 0x20f   : > { %4803 = vst.msk [vmem:[%s8036_s20] sm:$0xff] %vm4802_vm8, %v4770_v49  ;;  %v4771_v1 = vmax.f32 %v4739_v23, 0.0  ;;  %v5871_v7 = vpop.f32.mrb[4].mxu0 }
 0x210   : > { %4806 = vst.msk [vmem:[%s8036_s20 + $0x18] sm:$0xff] %vm4802_vm8, %v4773_v25  ;;  %v5903_v61 = vadd.f32 %v5871_v7, %v5701_v58  ;;  %v4588_v22 = vpop.f32.mrb[5].mxu0 }
 0x211   : > { %4804 = vst.msk [vmem:[%s8036_s20 + $0x8] sm:$0xff] %vm4802_vm8, %v4771_v1  ;;  %v5904_v44 = vadd.f32 %v4588_v22, %v1837_v50  ;;  %v5872_v3 = vpop.f32.mrb[6].mxu0 }
 0x212   : > { %v4744_v51 = vadd.f32 %v5903_v61, %v8029_v2  ;;  %v5905_v28 = vadd.f32 %v5872_v3, %v5702_v54  ;;  %v4591_v45 = vpop.f32.mrb[7].mxu0 }
 0x213   : > { %v4742_v27 = vadd.f32 %v5904_v44, %v8029_v2  ;;  %v5906_v53 = vadd.f32 %v4591_v45, %v1840_v18 }
 0x214   : > { %v4776_v21 = vmax.f32 %v4744_v51, 0.0  ;;  %v4745_v47 = vadd.f32 %v5905_v28, %v8029_v2 }
 0x215   : > { %v4774_v46 = vmax.f32 %v4742_v27, 0.0  ;;  %v4743_v15 = vadd.f32 %v5906_v53, %v8029_v2 }
 0x216   : > { %4809 = vst.msk [vmem:[%s8036_s20 + $0x30] sm:$0xff] %vm4802_vm8, %v4776_v21  ;;  %v4777_v60 = vmax.f32 %v4745_v47, 0.0 }
 0x217   : > { %4807 = vst.msk [vmem:[%s8036_s20 + $0x20] sm:$0xff] %vm4802_vm8, %v4774_v46  ;;  %v4775_v20 = vmax.f32 %v4743_v15, 0.0  ;;  %v5875_v42 = vpop.f32.mrb[8].mxu0 }
 0x218   : > { %4810 = vst.msk [vmem:[%s8036_s20 + $0x38] sm:$0xff] %vm4802_vm8, %v4777_v60  ;;  %v5907_v33 = vadd.f32 %v5875_v42, %v5705_v11  ;;  %v4604_v12 = vpop.f32.mrb[9].mxu0 }
 0x219   : > { %4808 = vst.msk [vmem:[%s8036_s20 + $0x28] sm:$0xff] %vm4802_vm8, %v4775_v20  ;;  %v5908_v31 = vadd.f32 %v4604_v12, %v1853_v32  ;;  %v5876_v57 = vpop.f32.mrb[10].mxu0 }
 0x21a   : > { %v4748_v8 = vadd.f32 %v5907_v33, %v8029_v2  ;;  %v5909_v48 = vadd.f32 %v5876_v57, %v5706_v24  ;;  %v4607_v62 = vpop.f32.mrb[11].mxu0 }
 0x21b   : > { %v4746_v56 = vadd.f32 %v5908_v31, %v8029_v2  ;;  %v5910_v40 = vadd.f32 %v4607_v62, %v1856_v19 }
 0x21c   : > { %v4780_v13 = vmax.f32 %v4748_v8, 0.0  ;;  %v4749_v17 = vadd.f32 %v5909_v48, %v8029_v2 }
 0x21d   : > { %v4778_v30 = vmax.f32 %v4746_v56, 0.0  ;;  %v4747_v9 = vadd.f32 %v5910_v40, %v8029_v2 }
 0x21e   : > { %4813 = vst.msk [vmem:[%s8036_s20 + $0x50] sm:$0xff] %vm4802_vm8, %v4780_v13  ;;  %v4781_v14 = vmax.f32 %v4749_v17, 0.0 }
 0x21f   : > { %4811 = vst.msk [vmem:[%s8036_s20 + $0x40] sm:$0xff] %vm4802_vm8, %v4778_v30  ;;  %v4779_v63 = vmax.f32 %v4747_v9, 0.0  ;;  %v5879_v4 = vpop.f32.mrb[12].mxu0 }
 0x220   : > { %4814 = vst.msk [vmem:[%s8036_s20 + $0x58] sm:$0xff] %vm4802_vm8, %v4781_v14  ;;  %v5911_v43 = vadd.f32 %v5879_v4, %v8018_v41  ;;  %v4620_v16 = vpop.f32.mrb[13].mxu0 }
 0x221   : > { %4812 = vst.msk [vmem:[%s8036_s20 + $0x48] sm:$0xff] %vm4802_vm8, %v4779_v63  ;;  %v5912_v58 = vadd.f32 %v4620_v16, %v8020_v5  ;;  %v5880_v50 = vpop.f32.mrb[14].mxu0 }
 0x222   : > { %v4752_v54 = vadd.f32 %v5911_v43, %v8029_v2  ;;  %v5913_v18 = vadd.f32 %v5880_v50, %v8022_v55  ;;  %v4623_v11 = vpop.f32.mrb[15].mxu0 }
 0x223   : > { %v4750_v32 = vadd.f32 %v5912_v58, %v8029_v2  ;;  %v5914_v24 = vadd.f32 %v4623_v11, %v8024_v29 }
 0x224   : > { %v4784_v19 = vmax.f32 %v4752_v54, 0.0  ;;  %v4753_v41 = vadd.f32 %v5913_v18, %v8029_v2 }
 0x225   : > { %v4782_v52 = vmax.f32 %v4750_v32, 0.0  ;;  %v4751_v39 = vadd.f32 %v5914_v24, %v8029_v2 }
 0x226   : > { %4817 = vst.msk [vmem:[%s8036_s20 + $0x70] sm:$0xff] %vm4802_vm8, %v4784_v19  ;;  %v4785_v5 = vmax.f32 %v4753_v41, 0.0 }
 0x227   : > { %4815 = vst.msk [vmem:[%s8036_s20 + $0x60] sm:$0xff] %vm4802_vm8, %v4782_v52  ;;  %v4783_v0 = vmax.f32 %v4751_v39, 0.0  ;;  %v5883_v36 = vpop.f32.mrb[16].mxu0 }
 0x228   : > { %4818 = vst.msk [vmem:[%s8036_s20 + $0x78] sm:$0xff] %vm4802_vm8, %v4785_v5  ;;  %v5747_v55 = vpop.f32.mrb[16].mxu1  ;;  %v4636_v10 = vpop.f32.mrb[17].mxu0 }
 0x229   : > { %4816 = vst.msk [vmem:[%s8036_s20 + $0x68] sm:$0xff] %vm4802_vm8, %v4783_v0  ;;  %v5915_v29 = vadd.f32 %v5883_v36, %v5747_v55  ;;  %v2611_v59 = vpop.f32.mrb[17].mxu1  ;;  %v5884_v38 = vpop.f32.mrb[18].mxu0 }
 0x22a   : > { %v5916_v37 = vadd.f32 %v4636_v10, %v2611_v59  ;;  %v5748_v26 = vpop.f32.mrb[18].mxu1  ;;  %v4639_v35 = vpop.f32.mrb[19].mxu0 }
 0x22b   : > { %v4756_v34 = vadd.f32 %v5915_v29, %v8029_v2  ;;  %v5917_v6 = vadd.f32 %v5884_v38, %v5748_v26  ;;  %v2614_v49 = vpop.f32.mrb[19].mxu1 }
 0x22c   : > { %v4754_v23 = vadd.f32 %v5916_v37, %v8029_v2  ;;  %v5918_v25 = vadd.f32 %v4639_v35, %v2614_v49 }
 0x22d   : > { %v4788_v1 = vmax.f32 %v4756_v34, 0.0  ;;  %v4757_v7 = vadd.f32 %v5917_v6, %v8029_v2 }
 0x22e   : > { %v4786_v61 = vmax.f32 %v4754_v23, 0.0  ;;  %v4755_v22 = vadd.f32 %v5918_v25, %v8029_v2 }
 0x22f   : > { %4821 = vst.msk [vmem:[%s8036_s20 + $0x90] sm:$0xff] %vm4802_vm8, %v4788_v1  ;;  %v4789_v44 = vmax.f32 %v4757_v7, 0.0  ;;  %v5887_v3 = vpop.f32.mrb[20].mxu0 }
 0x230   : > { %4819 = vst.msk [vmem:[%s8036_s20 + $0x80] sm:$0xff] %vm4802_vm8, %v4786_v61  ;;  %v4787_v51 = vmax.f32 %v4755_v22, 0.0  ;;  %v5751_v28 = vpop.f32.mrb[20].mxu1  ;;  %v4652_v45 = vpop.f32.mrb[21].mxu0 }
 0x231   : > { %4822 = vst.msk [vmem:[%s8036_s20 + $0x98] sm:$0xff] %vm4802_vm8, %v4789_v44  ;;  %v5919_v27 = vadd.f32 %v5887_v3, %v5751_v28  ;;  %v2627_v53 = vpop.f32.mrb[21].mxu1  ;;  %v5888_v21 = vpop.f32.mrb[22].mxu0 }
 0x232   : > { %4820 = vst.msk [vmem:[%s8036_s20 + $0x88] sm:$0xff] %vm4802_vm8, %v4787_v51  ;;  %v5920_v47 = vadd.f32 %v4652_v45, %v2627_v53  ;;  %v5752_v46 = vpop.f32.mrb[22].mxu1  ;;  %v4655_v15 = vpop.f32.mrb[23].mxu0 }
 0x233   : > { %v4760_v60 = vadd.f32 %v5919_v27, %v8029_v2  ;;  %v5921_v20 = vadd.f32 %v5888_v21, %v5752_v46  ;;  %v2630_v42 = vpop.f32.mrb[23].mxu1 }
 0x234   : > { %v4758_v33 = vadd.f32 %v5920_v47, %v8029_v2  ;;  %v5922_v12 = vadd.f32 %v4655_v15, %v2630_v42 }
 0x235   : > { %v4792_v31 = vmax.f32 %v4760_v60, 0.0  ;;  %v4761_v57 = vadd.f32 %v5921_v20, %v8029_v2 }
 0x236   : > { %v4790_v8 = vmax.f32 %v4758_v33, 0.0  ;;  %v4759_v48 = vadd.f32 %v5922_v12, %v8029_v2 }
 0x237   : > { %4825 = vst.msk [vmem:[%s8036_s20 + $0xb0] sm:$0xff] %vm4802_vm8, %v4792_v31  ;;  %v4793_v62 = vmax.f32 %v4761_v57, 0.0  ;;  %v5891_v56 = vpop.f32.mrb[24].mxu0 }
 0x238   : > { %4823 = vst.msk [vmem:[%s8036_s20 + $0xa0] sm:$0xff] %vm4802_vm8, %v4790_v8  ;;  %v4791_v40 = vmax.f32 %v4759_v48, 0.0  ;;  %v5755_v13 = vpop.f32.mrb[24].mxu1  ;;  %v4668_v17 = vpop.f32.mrb[25].mxu0 }
 0x239   : > { %4826 = vst.msk [vmem:[%s8036_s20 + $0xb8] sm:$0xff] %vm4802_vm8, %v4793_v62  ;;  %v5923_v30 = vadd.f32 %v5891_v56, %v5755_v13  ;;  %v2643_v9 = vpop.f32.mrb[25].mxu1  ;;  %v5892_v14 = vpop.f32.mrb[26].mxu0 }
 0x23a   : > { %4824 = vst.msk [vmem:[%s8036_s20 + $0xa8] sm:$0xff] %vm4802_vm8, %v4791_v40  ;;  %v5924_v63 = vadd.f32 %v4668_v17, %v2643_v9  ;;  %v5756_v4 = vpop.f32.mrb[26].mxu1  ;;  %v4671_v43 = vpop.f32.mrb[27].mxu0 }
 0x23b   : > { %v4764_v16 = vadd.f32 %v5923_v30, %v8029_v2  ;;  %v5925_v58 = vadd.f32 %v5892_v14, %v5756_v4  ;;  %v2646_v50 = vpop.f32.mrb[27].mxu1 }
 0x23c   : > { %v4762_v54 = vadd.f32 %v5924_v63, %v8029_v2  ;;  %v5926_v18 = vadd.f32 %v4671_v43, %v2646_v50 }
 0x23d   : > { %v4796_v11 = vmax.f32 %v4764_v16, 0.0  ;;  %v4765_v32 = vadd.f32 %v5925_v58, %v8029_v2 }
 0x23e   : > { %v4794_v24 = vmax.f32 %v4762_v54, 0.0  ;;  %v4763_v19 = vadd.f32 %v5926_v18, %v8029_v2 }
 0x23f   : > { %4829 = vst.msk [vmem:[%s8036_s20 + $0xd0] sm:$0xff] %vm4802_vm8, %v4796_v11  ;;  %v4797_v41 = vmax.f32 %v4765_v32, 0.0  ;;  %v5895_v52 = vpop.f32.mrb[28].mxu0 }
 0x240   : > { %4827 = vst.msk [vmem:[%s8036_s20 + $0xc0] sm:$0xff] %vm4802_vm8, %v4794_v24  ;;  %v4795_v39 = vmax.f32 %v4763_v19, 0.0  ;;  %v5759_v5 = vpop.f32.mrb[28].mxu1  ;;  %v4684_v0 = vpop.f32.mrb[29].mxu0 }
 0x241   : > { %4830 = vst.msk [vmem:[%s8036_s20 + $0xd8] sm:$0xff] %vm4802_vm8, %v4797_v41  ;;  %v5927_v36 = vadd.f32 %v5895_v52, %v5759_v5  ;;  %v2659_v55 = vpop.f32.mrb[29].mxu1  ;;  %v5896_v10 = vpop.f32.mrb[30].mxu0 }
 0x242   : > { %4828 = vst.msk [vmem:[%s8036_s20 + $0xc8] sm:$0xff] %vm4802_vm8, %v4795_v39  ;;  %v5928_v29 = vadd.f32 %v4684_v0, %v2659_v55  ;;  %v5760_v59 = vpop.f32.mrb[30].mxu1  ;;  %v4687_v38 = vpop.f32.mrb[31].mxu0 }
 0x243   : > { %v4768_v37 = vadd.f32 %v5927_v36, %v8029_v2  ;;  %v5929_v26 = vadd.f32 %v5896_v10, %v5760_v59  ;;  %v2662_v35 = vpop.f32.mrb[31].mxu1 }
 0x244   : > { %v4766_v34 = vadd.f32 %v5928_v29, %v8029_v2  ;;  %v5930_v6 = vadd.f32 %v4687_v38, %v2662_v35 }
 0x245   : > { %v4800_v49 = vmax.f32 %v4768_v37, 0.0  ;;  %v4769_v23 = vadd.f32 %v5929_v26, %v8029_v2 }
 0x246   : > { %v4798_v25 = vmax.f32 %v4766_v34, 0.0  ;;  %v4767_v1 = vadd.f32 %v5930_v6, %v8029_v2 }
 0x247   : > { %4833 = vst.msk [vmem:[%s8036_s20 + $0xf0] sm:$0xff] %vm4802_vm8, %v4800_v49  ;;  %v4801_v7 = vmax.f32 %v4769_v23, 0.0 }
 0x248   : > { %4831 = vst.msk [vmem:[%s8036_s20 + $0xe0] sm:$0xff] %vm4802_vm8, %v4798_v25  ;;  %v4799_v61 = vmax.f32 %v4767_v1, 0.0 }
 0x249   : > { %4834 = vst.msk [vmem:[%s8036_s20 + $0xf8] sm:$0xff] %vm4802_vm8, %v4801_v7 }
 0x24a   : > { %4832 = vst.msk [vmem:[%s8036_s20 + $0xe8] sm:$0xff] %vm4802_vm8, %v4799_v61 }
 0x24b PF: > { %s13_s12 = sadd.s32 1, %s6285_s12  }
 0x24c   : > { %p10_p4 = scmp.ge.s32.totalorder %s13_s12, 4  }
 0x24e   :  { %12 = sbr.rel (!%p10_p4) target bundleno = 1 (0x1), region = 72 }

</bundles_post_ra>
